<compile_context>
chip_gen: v7x
topology: tpu7x:2x2x1
jax: 0.10.0
libtpu: 0.0.40
codegen_flags: <defaults>
</compile_context>

<pallas_src>
import functools

import jax
import jax.numpy as jnp
from jax import lax
from jax.experimental import pallas as pl
from jax.experimental.pallas import tpu as pltpu


# ---------------------------------------------------------------------------
# in-kernel helpers (f32 VPU math)
# ---------------------------------------------------------------------------
def _layernorm(x, gamma, beta, eps=1e-5):
    mu = jnp.mean(x, axis=-1, keepdims=True)
    var = jnp.mean((x - mu) ** 2, axis=-1, keepdims=True)
    return (x - mu) * lax.rsqrt(var + eps) * gamma + beta


def _gelu(x):
    # nn.GELU() default = exact erf formulation (kept for parity; the
    # tanh-approx/EUP variant changes numerics).
    return 0.5 * x * (1.0 + lax.erf(x * 0.7071067811865476))


def _fused_transpose(a, Bt, rows, cols):
    """Per-batch transpose of a fused 2-D slab: (Bt*rows, cols) -> (Bt*cols, rows).

    Bt == 1 -> plain 2-D minor-dim transpose.
    Bt  > 1 -> one batched swapaxes over the (free) leading-dim split, instead
               of a Python loop of slices + transposes + an N-way concatenate.
    """
    if Bt == 1:
        return a.T
    return jnp.swapaxes(a.reshape(Bt, rows, cols), 1, 2).reshape(Bt * cols, rows)


# ---------------------------------------------------------------------------
# Pallas kernel: one grid step == one batch tile of Bt elements
# ---------------------------------------------------------------------------
def residual_mixer_kernel(
    x_ref,                                   # (Bt, P, C) f32
    vc_ref, vh_ref, vp_ref,                  # packed vectors: (5,C), (6,H), (1,P)
    w1p_ref, w2p_ref, w1c_ref, w2c_ref,      # bf16 weights: (P,H) (H,P) (C,H) (H,C)
    o_ref,                                   # (Bt, P, C)
    *, Bt, P, C,
):
    f32 = jnp.float32
    bf16 = jnp.bfloat16

    g1, b1 = vc_ref[0, :], vc_ref[1, :]
    g2, b2 = vc_ref[2, :], vc_ref[3, :]
    bc2 = vc_ref[4, :]
    bp1, glnp, blnp = vh_ref[0, :], vh_ref[1, :], vh_ref[2, :]
    bc1, glnc, blnc = vh_ref[3, :], vh_ref[4, :], vh_ref[5, :]
    bp2 = vp_ref[0, :]

    x2 = x_ref[...].reshape(Bt * P, C)                   # fused (rows, C) slab

    # --- token-mixing branch (patch MLP over the P axis) ---------------------
    h = _layernorm(x2, g1, b1)                           # norm_1 over channel
    ht = _fused_transpose(h, Bt, P, C)                   # (Bt*C, P)
    y = jnp.dot(ht.astype(bf16), w1p_ref[...],
                preferred_element_type=f32) + bp1        # (Bt*C, H)
    y = _gelu(y)
    y = _layernorm(y, glnp, blnp)
    y = jnp.dot(y.astype(bf16), w2p_ref[...],
                preferred_element_type=f32) + bp2        # (Bt*C, P)
    y_pc = _fused_transpose(y, Bt, C, P)                 # (Bt*P, C)
    # Re-read x at the residual add so its vregs need not stay live across
    # the whole token-mixing branch (one extra vld, less vreg pressure).
    x1 = x_ref[...].reshape(Bt * P, C) + y_pc            # patch_x

    # --- channel-mixing branch (channel MLP over the C axis) -----------------
    z = _layernorm(x1, g2, b2)                           # norm_2 over channel
    z = jnp.dot(z.astype(bf16), w1c_ref[...],
                preferred_element_type=f32) + bc1        # (Bt*P, H)
    z = _gelu(z)
    z = _layernorm(z, glnc, blnc)
    z = jnp.dot(z.astype(bf16), w2c_ref[...],
                preferred_element_type=f32) + bc2        # (Bt*P, C)

    o_ref[...] = (z + x1).reshape(Bt, P, C).astype(o_ref.dtype)


# ---------------------------------------------------------------------------
# wrapper-side helpers
# ---------------------------------------------------------------------------
def _vmem_limit_bytes():
    """Generation-aware VMEM limit: ~96 MiB on 128-MiB parts (v5e/v6e),
    ~48 MiB on 64-MiB parts (v7x)."""
    try:
        cap = int(pltpu.get_tpu_info().vmem_capacity_bytes)
    except Exception:
        cap = 64 * 1024 * 1024          # conservative (v7x-sized) fallback
    return min(96 * 1024 * 1024, (cap * 3) // 4)


def _pick_batch_tile(B, P, C, H, vmem_budget):
    """Largest divisor Bt of B such that (a) >= 2 grid steps remain when
    B >= 2 (keeps v7x's second TensorCore busy) and (b) the estimated peak
    VMEM footprint fits the budget; stops growing once the fused matmul M
    dimensions reach ~1024 rows."""
    target_rows = 1024
    max_bt = B if B < 2 else B // 2
    best = 1
    for bt in range(1, max_bt + 1):
        if B % bt:
            continue
        m = max(bt * P, bt * C)
        est = (3 * m * H * 4                              # f32 (M,H) hidden copies
               + 2 * 2 * bt * P * C * 4                   # double-buffered in/out
               + 2 * (P * H + H * P + C * H + H * C)      # resident bf16 weights
               + 4 * (5 * C + 6 * H + P))                 # packed vectors
        if est > vmem_budget:
            break                                         # est is monotone in bt
        best = bt
        if bt * P >= target_rows and bt * C >= target_rows:
            break
    return best


def prepare_params(params):
    """One-time parameter prep (hoisted out of the per-call hot path):
    pack the ten tiny vectors into three arrays and cast weights to bf16."""
    vec_c = jnp.stack([params["g1"], params["b1"], params["g2"], params["b2"],
                       params["bc2"]]).astype(jnp.float32)            # (5, C)
    vec_h = jnp.stack([params["bp1"], params["glnp"], params["blnp"],
                       params["bc1"], params["glnc"], params["blnc"]]
                      ).astype(jnp.float32)                           # (6, H)
    vec_p = params["bp2"][None, :].astype(jnp.float32)                # (1, P)
    return {
        "vec_c": vec_c, "vec_h": vec_h, "vec_p": vec_p,
        "w1p": params["w1p"].astype(jnp.bfloat16),                    # (P, H)
        "w2p": params["w2p"].astype(jnp.bfloat16),                    # (H, P)
        "w1c": params["w1c"].astype(jnp.bfloat16),                    # (C, H)
        "w2c": params["w2c"].astype(jnp.bfloat16),                    # (H, C)
    }


def residual_mixer(x, prep):
    """x: (B, P, C) float32.  prep: output of prepare_params()."""
    B, P, C = x.shape
    H = prep["w1c"].shape[1]

    vmem_limit = _vmem_limit_bytes()
    Bt = _pick_batch_tile(B, P, C, H, vmem_limit)

    kernel = functools.partial(residual_mixer_kernel, Bt=Bt, P=P, C=C)

    def _call(single_buffer_consts):
        def const_spec(arr):
            nd = arr.ndim
            idx = lambda b, _nd=nd: (0,) * _nd
            if single_buffer_consts:
                # Constant block index every step -> double buffering is pure
                # VMEM waste; request a single buffer.
                return pl.BlockSpec(arr.shape, idx, pipeline_mode=pl.Buffered(1))
            return pl.BlockSpec(arr.shape, idx)

        return pl.pallas_call(
            kernel,
            out_shape=jax.ShapeDtypeStruct((B, P, C), x.dtype),
            grid_spec=pltpu.PrefetchScalarGridSpec(
                num_scalar_prefetch=0,
                grid=(B // Bt,),
                in_specs=[pl.BlockSpec((Bt, P, C), lambda b: (b, 0, 0)),
                          const_spec(prep["vec_c"]), const_spec(prep["vec_h"]),
                          const_spec(prep["vec_p"]),
                          const_spec(prep["w1p"]), const_spec(prep["w2p"]),
                          const_spec(prep["w1c"]), const_spec(prep["w2c"])],
                out_specs=pl.BlockSpec((Bt, P, C), lambda b: (b, 0, 0)),
            ),
            compiler_params=pltpu.CompilerParams(
                dimension_semantics=("parallel",),
                vmem_limit_bytes=vmem_limit,
            ),
        )(x, prep["vec_c"], prep["vec_h"], prep["vec_p"],
          prep["w1p"], prep["w2p"], prep["w1c"], prep["w2c"])

    try:
        return _call(True)
    except Exception:
        # Fallback if this JAX build rejects pipeline_mode=pl.Buffered(1)
        # on constant-index BlockSpecs.
        return _call(False)


# ---------------------------------------------------------------------------
# pure-JAX reference (mirrors the PyTorch forward, eval mode)
# ---------------------------------------------------------------------------
def reference(x, p, matmul_dtype=jnp.float32):
    f32 = jnp.float32

    def ln(v, g, b, eps=1e-5):
        mu = jnp.mean(v, -1, keepdims=True)
        var = jnp.mean((v - mu) ** 2, -1, keepdims=True)
        return (v - mu) * lax.rsqrt(var + eps) * g + b

    def gelu(v):
        return 0.5 * v * (1.0 + lax.erf(v * 0.7071067811865476))

    def mm(a, w):
        return jnp.dot(a.astype(matmul_dtype), w.astype(matmul_dtype),
                       preferred_element_type=f32)

    h = ln(x, p["g1"], p["b1"])
    ht = jnp.swapaxes(h, -2, -1)
    y = gelu(mm(ht, p["w1p"]) + p["bp1"])
    y = ln(y, p["glnp"], p["blnp"])
    y = mm(y, p["w2p"]) + p["bp2"]
    x1 = jnp.swapaxes(y, -2, -1) + x
    z = ln(x1, p["g2"], p["b2"])
    z = gelu(mm(z, p["w1c"]) + p["bc1"])
    z = ln(z, p["glnc"], p["blnc"])
    z = mm(z, p["w2c"]) + p["bc2"]
    return z + x1


# ---------------------------------------------------------------------------
def make_params(key, P, C, H):
    ks = jax.random.split(key, 16)
    n = lambda k, s, scale: (scale * jax.random.normal(k, s)).astype(jnp.float32)
    return {
        # outer LayerNorms (over channel)
        "g1": 1.0 + n(ks[0], (C,), 0.05), "b1": n(ks[1], (C,), 0.05),
        "g2": 1.0 + n(ks[2], (C,), 0.05), "b2": n(ks[3], (C,), 0.05),
        # patch MLP: Linear(P->H), LN(H), Linear(H->P)  (weights pre-transposed)
        "w1p": n(ks[4], (P, H), 0.2), "bp1": n(ks[5], (H,), 0.05),
        "glnp": 1.0 + n(ks[6], (H,), 0.05), "blnp": n(ks[7], (H,), 0.02),
        "w2p": n(ks[8], (H, P), 0.2), "bp2": n(ks[9], (P,), 0.05),
        # channel MLP: Linear(C->H), LN(H), Linear(H->C)
        "w1c": n(ks[10], (C, H), 0.2), "bc1": n(ks[11], (H,), 0.05),
        "glnc": 1.0 + n(ks[12], (H,), 0.05), "blnc": n(ks[13], (H,), 0.02),
        "w2c": n(ks[14], (H, C), 0.2), "bc2": n(ks[15], (C,), 0.05),
    }


if __name__ == "__main__":
    B, P, C, H = 2, 8, 16, 32   # batch, patch, channel, hidden_dim
    key = jax.random.PRNGKey(0)
    kx, kp = jax.random.split(key)
    x = jax.random.normal(kx, (B, P, C), dtype=jnp.float32)
    params = make_params(kp, P, C, H)

    # TODO(synk): training-mode dropout (pltpu.prng_*) not implemented; eval-mode identity.
    prep = prepare_params(params)           # hoisted, one-time param prep
    out = residual_mixer(x, prep)
    out = jax.block_until_ready(out)

    ref_bf16 = reference(x, params, matmul_dtype=jnp.bfloat16)  # matched precision
    ref_f32 = reference(x, params, matmul_dtype=jnp.float32)    # full precision

    assert out.shape == (B, P, C)
    assert jnp.allclose(out, ref_bf16, atol=1e-3, rtol=1e-3), \
        "mismatch vs matched-precision reference"
    assert jnp.allclose(out, ref_f32, atol=5e-2, rtol=5e-2), \
        "mismatch vs f32 reference"
    print("KERNEL_OK")
</pallas_src>

<mosaic_0001>
module attributes {stable_mosaic.version = 11 : i64} {
  func.func @residual_mixer_kernel(%arg0: i32, %arg1: memref<1x8x16xf32, #tpu.memory_space<vmem>>, %arg2: memref<5x16xf32, #tpu.memory_space<vmem>>, %arg3: memref<6x32xf32, #tpu.memory_space<vmem>>, %arg4: memref<1x8xf32, #tpu.memory_space<vmem>>, %arg5: memref<8x32xbf16, #tpu.memory_space<vmem>>, %arg6: memref<32x8xbf16, #tpu.memory_space<vmem>>, %arg7: memref<16x32xbf16, #tpu.memory_space<vmem>>, %arg8: memref<32x16xbf16, #tpu.memory_space<vmem>>, %arg9: memref<1x8x16xf32, #tpu.memory_space<vmem>>) attributes {dimension_semantics = [#tpu.dimension_semantics<parallel>], iteration_bounds = array<i64: 2>, scalar_prefetch = 0 : i64, scratch_operands = 0 : i64, tpu.core_type = #tpu.core_type<tc>, window_params = [{transform_indices = @transform_0, window_bounds = array<i64: 1, 8, 16>}, {pipeline_mode = #tpu.pipeline_mode<synchronous>, transform_indices = @transform_1, window_bounds = array<i64: 5, 16>}, {pipeline_mode = #tpu.pipeline_mode<synchronous>, transform_indices = @transform_2, window_bounds = array<i64: 6, 32>}, {pipeline_mode = #tpu.pipeline_mode<synchronous>, transform_indices = @transform_3, window_bounds = array<i64: 1, 8>}, {pipeline_mode = #tpu.pipeline_mode<synchronous>, transform_indices = @transform_4, window_bounds = array<i64: 8, 32>}, {pipeline_mode = #tpu.pipeline_mode<synchronous>, transform_indices = @transform_5, window_bounds = array<i64: 32, 8>}, {pipeline_mode = #tpu.pipeline_mode<synchronous>, transform_indices = @transform_6, window_bounds = array<i64: 16, 32>}, {pipeline_mode = #tpu.pipeline_mode<synchronous>, transform_indices = @transform_7, window_bounds = array<i64: 32, 16>}, {transform_indices = @transform_8, window_bounds = array<i64: 1, 8, 16>}]} {
    %c0 = arith.constant 0 : index
    %c0_0 = arith.constant 0 : index
    %0 = vector.load %arg2[%c0, %c0_0] : memref<5x16xf32, #tpu.memory_space<vmem>>, vector<1x16xf32>
    %1 = vector.shape_cast %0 : vector<1x16xf32> to vector<16xf32>
    %c1 = arith.constant 1 : index
    %c0_1 = arith.constant 0 : index
    %2 = vector.load %arg2[%c1, %c0_1] : memref<5x16xf32, #tpu.memory_space<vmem>>, vector<1x16xf32>
    %3 = vector.shape_cast %2 : vector<1x16xf32> to vector<16xf32>
    %c2 = arith.constant 2 : index
    %c0_2 = arith.constant 0 : index
    %4 = vector.load %arg2[%c2, %c0_2] : memref<5x16xf32, #tpu.memory_space<vmem>>, vector<1x16xf32>
    %5 = vector.shape_cast %4 : vector<1x16xf32> to vector<16xf32>
    %c3 = arith.constant 3 : index
    %c0_3 = arith.constant 0 : index
    %6 = vector.load %arg2[%c3, %c0_3] : memref<5x16xf32, #tpu.memory_space<vmem>>, vector<1x16xf32>
    %7 = vector.shape_cast %6 : vector<1x16xf32> to vector<16xf32>
    %c4 = arith.constant 4 : index
    %c0_4 = arith.constant 0 : index
    %8 = vector.load %arg2[%c4, %c0_4] : memref<5x16xf32, #tpu.memory_space<vmem>>, vector<1x16xf32>
    %9 = vector.shape_cast %8 : vector<1x16xf32> to vector<16xf32>
    %c0_5 = arith.constant 0 : index
    %c0_6 = arith.constant 0 : index
    %10 = vector.load %arg3[%c0_5, %c0_6] : memref<6x32xf32, #tpu.memory_space<vmem>>, vector<1x32xf32>
    %11 = vector.shape_cast %10 : vector<1x32xf32> to vector<32xf32>
    %c1_7 = arith.constant 1 : index
    %c0_8 = arith.constant 0 : index
    %12 = vector.load %arg3[%c1_7, %c0_8] : memref<6x32xf32, #tpu.memory_space<vmem>>, vector<1x32xf32>
    %13 = vector.shape_cast %12 : vector<1x32xf32> to vector<32xf32>
    %c2_9 = arith.constant 2 : index
    %c0_10 = arith.constant 0 : index
    %14 = vector.load %arg3[%c2_9, %c0_10] : memref<6x32xf32, #tpu.memory_space<vmem>>, vector<1x32xf32>
    %15 = vector.shape_cast %14 : vector<1x32xf32> to vector<32xf32>
    %c3_11 = arith.constant 3 : index
    %c0_12 = arith.constant 0 : index
    %16 = vector.load %arg3[%c3_11, %c0_12] : memref<6x32xf32, #tpu.memory_space<vmem>>, vector<1x32xf32>
    %17 = vector.shape_cast %16 : vector<1x32xf32> to vector<32xf32>
    %c4_13 = arith.constant 4 : index
    %c0_14 = arith.constant 0 : index
    %18 = vector.load %arg3[%c4_13, %c0_14] : memref<6x32xf32, #tpu.memory_space<vmem>>, vector<1x32xf32>
    %19 = vector.shape_cast %18 : vector<1x32xf32> to vector<32xf32>
    %c5 = arith.constant 5 : index
    %c0_15 = arith.constant 0 : index
    %20 = vector.load %arg3[%c5, %c0_15] : memref<6x32xf32, #tpu.memory_space<vmem>>, vector<1x32xf32>
    %21 = vector.shape_cast %20 : vector<1x32xf32> to vector<32xf32>
    %c0_16 = arith.constant 0 : index
    %c0_17 = arith.constant 0 : index
    %22 = vector.load %arg4[%c0_16, %c0_17] : memref<1x8xf32, #tpu.memory_space<vmem>>, vector<1x8xf32>
    %23 = vector.shape_cast %22 : vector<1x8xf32> to vector<8xf32>
    %c0_18 = arith.constant 0 : index
    %c0_19 = arith.constant 0 : index
    %c0_20 = arith.constant 0 : index
    %24 = vector.load %arg1[%c0_18, %c0_19, %c0_20] : memref<1x8x16xf32, #tpu.memory_space<vmem>>, vector<1x8x16xf32>
    %25 = vector.shape_cast %24 : vector<1x8x16xf32> to vector<8x16xf32>
    %cst = arith.constant dense<0.000000e+00> : vector<8xf32>
    %26 = vector.multi_reduction <add>, %25, %cst [1] : vector<8x16xf32> to vector<8xf32>
    %27 = vector.shape_cast %26 : vector<8xf32> to vector<8x1xf32>
    %cst_21 = arith.constant 1.600000e+01 : f32
    %28 = vector.broadcast %cst_21 : f32 to vector<8x1xf32>
    %29 = arith.divf %27, %28 : vector<8x1xf32>
    %30 = vector.broadcast %29 : vector<8x1xf32> to vector<8x16xf32>
    %31 = arith.subf %25, %30 : vector<8x16xf32>
    %32 = arith.mulf %31, %31 : vector<8x16xf32>
    %cst_22 = arith.constant dense<0.000000e+00> : vector<8xf32>
    %33 = vector.multi_reduction <add>, %32, %cst_22 [1] : vector<8x16xf32> to vector<8xf32>
    %34 = vector.shape_cast %33 : vector<8xf32> to vector<8x1xf32>
    %cst_23 = arith.constant 1.600000e+01 : f32
    %35 = vector.broadcast %cst_23 : f32 to vector<8x1xf32>
    %36 = arith.divf %34, %35 : vector<8x1xf32>
    %37 = vector.broadcast %29 : vector<8x1xf32> to vector<8x16xf32>
    %38 = arith.subf %25, %37 : vector<8x16xf32>
    %cst_24 = arith.constant 9.99999974E-6 : f32
    %39 = vector.broadcast %cst_24 : f32 to vector<8x1xf32>
    %40 = arith.addf %36, %39 : vector<8x1xf32>
    %41 = math.rsqrt %40 : vector<8x1xf32>
    %42 = vector.broadcast %41 : vector<8x1xf32> to vector<8x16xf32>
    %43 = arith.mulf %38, %42 : vector<8x16xf32>
    %44 = vector.shape_cast %1 : vector<16xf32> to vector<1x16xf32>
    %45 = vector.broadcast %44 : vector<1x16xf32> to vector<8x16xf32>
    %46 = arith.mulf %43, %45 : vector<8x16xf32>
    %47 = vector.shape_cast %3 : vector<16xf32> to vector<1x16xf32>
    %48 = vector.broadcast %47 : vector<1x16xf32> to vector<8x16xf32>
    %49 = arith.addf %46, %48 : vector<8x16xf32>
    %50 = tpu.transpose %49, [1, 0] : vector<8x16xf32> -> vector<16x8xf32>
    %51 = arith.truncf %50 : vector<16x8xf32> to vector<16x8xbf16>
    %c0_25 = arith.constant 0 : index
    %c0_26 = arith.constant 0 : index
    %52 = vector.load %arg5[%c0_25, %c0_26] : memref<8x32xbf16, #tpu.memory_space<vmem>>, vector<8x32xbf16>
    %cst_27 = arith.constant dense<0.000000e+00> : vector<16x32xf32>
    %53 = tpu.matmul %51, %52, %cst_27 {dimension_numbers = #tpu.dot_dimension_numbers<[1], [0], [0], [1], [0, 0, 1, 1], [], []>} : vector<16x8xbf16>, vector<8x32xbf16>, vector<16x32xf32> -> vector<16x32xf32>
    %54 = vector.shape_cast %11 : vector<32xf32> to vector<1x32xf32>
    %55 = vector.broadcast %54 : vector<1x32xf32> to vector<16x32xf32>
    %56 = arith.addf %53, %55 : vector<16x32xf32>
    %cst_28 = arith.constant 5.000000e-01 : f32
    %57 = vector.broadcast %cst_28 : f32 to vector<16x32xf32>
    %58 = arith.mulf %57, %56 : vector<16x32xf32>
    %cst_29 = arith.constant 0.707106769 : f32
    %59 = vector.broadcast %cst_29 : f32 to vector<16x32xf32>
    %60 = arith.mulf %56, %59 : vector<16x32xf32>
    %61 = math.erf %60 : vector<16x32xf32>
    %cst_30 = arith.constant 1.000000e+00 : f32
    %62 = vector.broadcast %cst_30 : f32 to vector<16x32xf32>
    %63 = arith.addf %62, %61 : vector<16x32xf32>
    %64 = arith.mulf %58, %63 : vector<16x32xf32>
    %cst_31 = arith.constant dense<0.000000e+00> : vector<16xf32>
    %65 = vector.multi_reduction <add>, %64, %cst_31 [1] : vector<16x32xf32> to vector<16xf32>
    %66 = vector.shape_cast %65 : vector<16xf32> to vector<16x1xf32>
    %cst_32 = arith.constant 3.200000e+01 : f32
    %67 = vector.broadcast %cst_32 : f32 to vector<16x1xf32>
    %68 = arith.divf %66, %67 : vector<16x1xf32>
    %69 = vector.broadcast %68 : vector<16x1xf32> to vector<16x32xf32>
    %70 = arith.subf %64, %69 : vector<16x32xf32>
    %71 = arith.mulf %70, %70 : vector<16x32xf32>
    %cst_33 = arith.constant dense<0.000000e+00> : vector<16xf32>
    %72 = vector.multi_reduction <add>, %71, %cst_33 [1] : vector<16x32xf32> to vector<16xf32>
    %73 = vector.shape_cast %72 : vector<16xf32> to vector<16x1xf32>
    %cst_34 = arith.constant 3.200000e+01 : f32
    %74 = vector.broadcast %cst_34 : f32 to vector<16x1xf32>
    %75 = arith.divf %73, %74 : vector<16x1xf32>
    %76 = vector.broadcast %68 : vector<16x1xf32> to vector<16x32xf32>
    %77 = arith.subf %64, %76 : vector<16x32xf32>
    %cst_35 = arith.constant 9.99999974E-6 : f32
    %78 = vector.broadcast %cst_35 : f32 to vector<16x1xf32>
    %79 = arith.addf %75, %78 : vector<16x1xf32>
    %80 = math.rsqrt %79 : vector<16x1xf32>
    %81 = vector.broadcast %80 : vector<16x1xf32> to vector<16x32xf32>
    %82 = arith.mulf %77, %81 : vector<16x32xf32>
    %83 = vector.shape_cast %13 : vector<32xf32> to vector<1x32xf32>
    %84 = vector.broadcast %83 : vector<1x32xf32> to vector<16x32xf32>
    %85 = arith.mulf %82, %84 : vector<16x32xf32>
    %86 = vector.shape_cast %15 : vector<32xf32> to vector<1x32xf32>
    %87 = vector.broadcast %86 : vector<1x32xf32> to vector<16x32xf32>
    %88 = arith.addf %85, %87 : vector<16x32xf32>
    %89 = arith.truncf %88 : vector<16x32xf32> to vector<16x32xbf16>
    %c0_36 = arith.constant 0 : index
    %c0_37 = arith.constant 0 : index
    %90 = vector.load %arg6[%c0_36, %c0_37] : memref<32x8xbf16, #tpu.memory_space<vmem>>, vector<32x8xbf16>
    %cst_38 = arith.constant dense<0.000000e+00> : vector<16x8xf32>
    %91 = tpu.matmul %89, %90, %cst_38 {dimension_numbers = #tpu.dot_dimension_numbers<[1], [0], [0], [1], [0, 0, 1, 1], [], []>} : vector<16x32xbf16>, vector<32x8xbf16>, vector<16x8xf32> -> vector<16x8xf32>
    %92 = vector.shape_cast %23 : vector<8xf32> to vector<1x8xf32>
    %93 = vector.broadcast %92 : vector<1x8xf32> to vector<16x8xf32>
    %94 = arith.addf %91, %93 : vector<16x8xf32>
    %95 = tpu.transpose %94, [1, 0] : vector<16x8xf32> -> vector<8x16xf32>
    %c0_39 = arith.constant 0 : index
    %c0_40 = arith.constant 0 : index
    %c0_41 = arith.constant 0 : index
    %96 = vector.load %arg1[%c0_39, %c0_40, %c0_41] : memref<1x8x16xf32, #tpu.memory_space<vmem>>, vector<1x8x16xf32>
    %97 = vector.shape_cast %96 : vector<1x8x16xf32> to vector<8x16xf32>
    %98 = arith.addf %97, %95 : vector<8x16xf32>
    %cst_42 = arith.constant dense<0.000000e+00> : vector<8xf32>
    %99 = vector.multi_reduction <add>, %98, %cst_42 [1] : vector<8x16xf32> to vector<8xf32>
    %100 = vector.shape_cast %99 : vector<8xf32> to vector<8x1xf32>
    %cst_43 = arith.constant 1.600000e+01 : f32
    %101 = vector.broadcast %cst_43 : f32 to vector<8x1xf32>
    %102 = arith.divf %100, %101 : vector<8x1xf32>
    %103 = vector.broadcast %102 : vector<8x1xf32> to vector<8x16xf32>
    %104 = arith.subf %98, %103 : vector<8x16xf32>
    %105 = arith.mulf %104, %104 : vector<8x16xf32>
    %cst_44 = arith.constant dense<0.000000e+00> : vector<8xf32>
    %106 = vector.multi_reduction <add>, %105, %cst_44 [1] : vector<8x16xf32> to vector<8xf32>
    %107 = vector.shape_cast %106 : vector<8xf32> to vector<8x1xf32>
    %cst_45 = arith.constant 1.600000e+01 : f32
    %108 = vector.broadcast %cst_45 : f32 to vector<8x1xf32>
    %109 = arith.divf %107, %108 : vector<8x1xf32>
    %110 = vector.broadcast %102 : vector<8x1xf32> to vector<8x16xf32>
    %111 = arith.subf %98, %110 : vector<8x16xf32>
    %cst_46 = arith.constant 9.99999974E-6 : f32
    %112 = vector.broadcast %cst_46 : f32 to vector<8x1xf32>
    %113 = arith.addf %109, %112 : vector<8x1xf32>
    %114 = math.rsqrt %113 : vector<8x1xf32>
    %115 = vector.broadcast %114 : vector<8x1xf32> to vector<8x16xf32>
    %116 = arith.mulf %111, %115 : vector<8x16xf32>
    %117 = vector.shape_cast %5 : vector<16xf32> to vector<1x16xf32>
    %118 = vector.broadcast %117 : vector<1x16xf32> to vector<8x16xf32>
    %119 = arith.mulf %116, %118 : vector<8x16xf32>
    %120 = vector.shape_cast %7 : vector<16xf32> to vector<1x16xf32>
    %121 = vector.broadcast %120 : vector<1x16xf32> to vector<8x16xf32>
    %122 = arith.addf %119, %121 : vector<8x16xf32>
    %123 = arith.truncf %122 : vector<8x16xf32> to vector<8x16xbf16>
    %c0_47 = arith.constant 0 : index
    %c0_48 = arith.constant 0 : index
    %124 = vector.load %arg7[%c0_47, %c0_48] : memref<16x32xbf16, #tpu.memory_space<vmem>>, vector<16x32xbf16>
    %cst_49 = arith.constant dense<0.000000e+00> : vector<8x32xf32>
    %125 = tpu.matmul %123, %124, %cst_49 {dimension_numbers = #tpu.dot_dimension_numbers<[1], [0], [0], [1], [0, 0, 1, 1], [], []>} : vector<8x16xbf16>, vector<16x32xbf16>, vector<8x32xf32> -> vector<8x32xf32>
    %126 = vector.shape_cast %17 : vector<32xf32> to vector<1x32xf32>
    %127 = vector.broadcast %126 : vector<1x32xf32> to vector<8x32xf32>
    %128 = arith.addf %125, %127 : vector<8x32xf32>
    %cst_50 = arith.constant 5.000000e-01 : f32
    %129 = vector.broadcast %cst_50 : f32 to vector<8x32xf32>
    %130 = arith.mulf %129, %128 : vector<8x32xf32>
    %cst_51 = arith.constant 0.707106769 : f32
    %131 = vector.broadcast %cst_51 : f32 to vector<8x32xf32>
    %132 = arith.mulf %128, %131 : vector<8x32xf32>
    %133 = math.erf %132 : vector<8x32xf32>
    %cst_52 = arith.constant 1.000000e+00 : f32
    %134 = vector.broadcast %cst_52 : f32 to vector<8x32xf32>
    %135 = arith.addf %134, %133 : vector<8x32xf32>
    %136 = arith.mulf %130, %135 : vector<8x32xf32>
    %cst_53 = arith.constant dense<0.000000e+00> : vector<8xf32>
    %137 = vector.multi_reduction <add>, %136, %cst_53 [1] : vector<8x32xf32> to vector<8xf32>
    %138 = vector.shape_cast %137 : vector<8xf32> to vector<8x1xf32>
    %cst_54 = arith.constant 3.200000e+01 : f32
    %139 = vector.broadcast %cst_54 : f32 to vector<8x1xf32>
    %140 = arith.divf %138, %139 : vector<8x1xf32>
    %141 = vector.broadcast %140 : vector<8x1xf32> to vector<8x32xf32>
    %142 = arith.subf %136, %141 : vector<8x32xf32>
    %143 = arith.mulf %142, %142 : vector<8x32xf32>
    %cst_55 = arith.constant dense<0.000000e+00> : vector<8xf32>
    %144 = vector.multi_reduction <add>, %143, %cst_55 [1] : vector<8x32xf32> to vector<8xf32>
    %145 = vector.shape_cast %144 : vector<8xf32> to vector<8x1xf32>
    %cst_56 = arith.constant 3.200000e+01 : f32
    %146 = vector.broadcast %cst_56 : f32 to vector<8x1xf32>
    %147 = arith.divf %145, %146 : vector<8x1xf32>
    %148 = vector.broadcast %140 : vector<8x1xf32> to vector<8x32xf32>
    %149 = arith.subf %136, %148 : vector<8x32xf32>
    %cst_57 = arith.constant 9.99999974E-6 : f32
    %150 = vector.broadcast %cst_57 : f32 to vector<8x1xf32>
    %151 = arith.addf %147, %150 : vector<8x1xf32>
    %152 = math.rsqrt %151 : vector<8x1xf32>
    %153 = vector.broadcast %152 : vector<8x1xf32> to vector<8x32xf32>
    %154 = arith.mulf %149, %153 : vector<8x32xf32>
    %155 = vector.shape_cast %19 : vector<32xf32> to vector<1x32xf32>
    %156 = vector.broadcast %155 : vector<1x32xf32> to vector<8x32xf32>
    %157 = arith.mulf %154, %156 : vector<8x32xf32>
    %158 = vector.shape_cast %21 : vector<32xf32> to vector<1x32xf32>
    %159 = vector.broadcast %158 : vector<1x32xf32> to vector<8x32xf32>
    %160 = arith.addf %157, %159 : vector<8x32xf32>
    %161 = arith.truncf %160 : vector<8x32xf32> to vector<8x32xbf16>
    %c0_58 = arith.constant 0 : index
    %c0_59 = arith.constant 0 : index
    %162 = vector.load %arg8[%c0_58, %c0_59] : memref<32x16xbf16, #tpu.memory_space<vmem>>, vector<32x16xbf16>
    %cst_60 = arith.constant dense<0.000000e+00> : vector<8x16xf32>
    %163 = tpu.matmul %161, %162, %cst_60 {dimension_numbers = #tpu.dot_dimension_numbers<[1], [0], [0], [1], [0, 0, 1, 1], [], []>} : vector<8x32xbf16>, vector<32x16xbf16>, vector<8x16xf32> -> vector<8x16xf32>
    %164 = vector.shape_cast %9 : vector<16xf32> to vector<1x16xf32>
    %165 = vector.broadcast %164 : vector<1x16xf32> to vector<8x16xf32>
    %166 = arith.addf %163, %165 : vector<8x16xf32>
    %167 = arith.addf %166, %98 : vector<8x16xf32>
    %168 = vector.shape_cast %167 : vector<8x16xf32> to vector<1x8x16xf32>
    %c0_61 = arith.constant 0 : index
    %c0_62 = arith.constant 0 : index
    %c0_63 = arith.constant 0 : index
    %169 = vector.load %arg9[%c0_61, %c0_62, %c0_63] : memref<1x8x16xf32, #tpu.memory_space<vmem>>, vector<1x8x16xf32>
    tpu.vector_store %arg9[%c0_61, %c0_62, %c0_63], %168 {strides = array<i32>} : memref<1x8x16xf32, #tpu.memory_space<vmem>>, vector<1x8x16xf32>,
    return
  }
  func.func @transform_0(%arg0: i32) -> (i32, i32, i32) {
    %c0_i32 = arith.constant 0 : i32
    %c0_i32_0 = arith.constant 0 : i32
    %c0_i32_1 = arith.constant 0 : i32
    return %arg0, %c0_i32, %c0_i32_0 : i32, i32, i32
  }
  func.func @transform_1(%arg0: i32) -> (i32, i32) {
    %c0_i32 = arith.constant 0 : i32
    %c0_i32_0 = arith.constant 0 : i32
    %c0_i32_1 = arith.constant 0 : i32
    return %c0_i32, %c0_i32_0 : i32, i32
  }
  func.func @transform_2(%arg0: i32) -> (i32, i32) {
    %c0_i32 = arith.constant 0 : i32
    %c0_i32_0 = arith.constant 0 : i32
    %c0_i32_1 = arith.constant 0 : i32
    return %c0_i32, %c0_i32_0 : i32, i32
  }
  func.func @transform_3(%arg0: i32) -> (i32, i32) {
    %c0_i32 = arith.constant 0 : i32
    %c0_i32_0 = arith.constant 0 : i32
    %c0_i32_1 = arith.constant 0 : i32
    return %c0_i32, %c0_i32_0 : i32, i32
  }
  func.func @transform_4(%arg0: i32) -> (i32, i32) {
    %c0_i32 = arith.constant 0 : i32
    %c0_i32_0 = arith.constant 0 : i32
    %c0_i32_1 = arith.constant 0 : i32
    return %c0_i32, %c0_i32_0 : i32, i32
  }
  func.func @transform_5(%arg0: i32) -> (i32, i32) {
    %c0_i32 = arith.constant 0 : i32
    %c0_i32_0 = arith.constant 0 : i32
    %c0_i32_1 = arith.constant 0 : i32
    return %c0_i32, %c0_i32_0 : i32, i32
  }
  func.func @transform_6(%arg0: i32) -> (i32, i32) {
    %c0_i32 = arith.constant 0 : i32
    %c0_i32_0 = arith.constant 0 : i32
    %c0_i32_1 = arith.constant 0 : i32
    return %c0_i32, %c0_i32_0 : i32, i32
  }
  func.func @transform_7(%arg0: i32) -> (i32, i32) {
    %c0_i32 = arith.constant 0 : i32
    %c0_i32_0 = arith.constant 0 : i32
    %c0_i32_1 = arith.constant 0 : i32
    return %c0_i32, %c0_i32_0 : i32, i32
  }
  func.func @transform_8(%arg0: i32) -> (i32, i32, i32) {
    %c0_i32 = arith.constant 0 : i32
    %c0_i32_0 = arith.constant 0 : i32
    %c0_i32_1 = arith.constant 0 : i32
    return %arg0, %c0_i32, %c0_i32_0 : i32, i32, i32
  }
}

module attributes {stable_mosaic.version = 11 : i64} {
  func.func @residual_mixer_kernel(%arg0: i32, %arg1: memref<1x8x16xf32, #tpu.memory_space<vmem>>, %arg2: memref<5x16xf32, #tpu.memory_space<vmem>>, %arg3: memref<6x32xf32, #tpu.memory_space<vmem>>, %arg4: memref<1x8xf32, #tpu.memory_space<vmem>>, %arg5: memref<8x32xbf16, #tpu.memory_space<vmem>>, %arg6: memref<32x8xbf16, #tpu.memory_space<vmem>>, %arg7: memref<16x32xbf16, #tpu.memory_space<vmem>>, %arg8: memref<32x16xbf16, #tpu.memory_space<vmem>>, %arg9: memref<1x8x16xf32, #tpu.memory_space<vmem>>) attributes {dimension_semantics = [#tpu.dimension_semantics<parallel>], iteration_bounds = array<i64: 2>, scalar_prefetch = 0 : i64, scratch_operands = 0 : i64, tpu.core_type = #tpu.core_type<tc>, window_params = [{transform_indices = @transform_0, window_bounds = array<i64: 1, 8, 16>}, {pipeline_mode = #tpu.pipeline_mode<synchronous>, transform_indices = @transform_1, window_bounds = array<i64: 5, 16>}, {pipeline_mode = #tpu.pipeline_mode<synchronous>, transform_indices = @transform_2, window_bounds = array<i64: 6, 32>}, {pipeline_mode = #tpu.pipeline_mode<synchronous>, transform_indices = @transform_3, window_bounds = array<i64: 1, 8>}, {pipeline_mode = #tpu.pipeline_mode<synchronous>, transform_indices = @transform_4, window_bounds = array<i64: 8, 32>}, {pipeline_mode = #tpu.pipeline_mode<synchronous>, transform_indices = @transform_5, window_bounds = array<i64: 32, 8>}, {pipeline_mode = #tpu.pipeline_mode<synchronous>, transform_indices = @transform_6, window_bounds = array<i64: 16, 32>}, {pipeline_mode = #tpu.pipeline_mode<synchronous>, transform_indices = @transform_7, window_bounds = array<i64: 32, 16>}, {transform_indices = @transform_8, window_bounds = array<i64: 1, 8, 16>}]} {
    %c0 = arith.constant 0 : index
    %c0_0 = arith.constant 0 : index
    %0 = vector.load %arg2[%c0, %c0_0] : memref<5x16xf32, #tpu.memory_space<vmem>>, vector<1x16xf32>
    %1 = vector.shape_cast %0 : vector<1x16xf32> to vector<16xf32>
    %c1 = arith.constant 1 : index
    %c0_1 = arith.constant 0 : index
    %2 = vector.load %arg2[%c1, %c0_1] : memref<5x16xf32, #tpu.memory_space<vmem>>, vector<1x16xf32>
    %3 = vector.shape_cast %2 : vector<1x16xf32> to vector<16xf32>
    %c2 = arith.constant 2 : index
    %c0_2 = arith.constant 0 : index
    %4 = vector.load %arg2[%c2, %c0_2] : memref<5x16xf32, #tpu.memory_space<vmem>>, vector<1x16xf32>
    %5 = vector.shape_cast %4 : vector<1x16xf32> to vector<16xf32>
    %c3 = arith.constant 3 : index
    %c0_3 = arith.constant 0 : index
    %6 = vector.load %arg2[%c3, %c0_3] : memref<5x16xf32, #tpu.memory_space<vmem>>, vector<1x16xf32>
    %7 = vector.shape_cast %6 : vector<1x16xf32> to vector<16xf32>
    %c4 = arith.constant 4 : index
    %c0_4 = arith.constant 0 : index
    %8 = vector.load %arg2[%c4, %c0_4] : memref<5x16xf32, #tpu.memory_space<vmem>>, vector<1x16xf32>
    %9 = vector.shape_cast %8 : vector<1x16xf32> to vector<16xf32>
    %c0_5 = arith.constant 0 : index
    %c0_6 = arith.constant 0 : index
    %10 = vector.load %arg3[%c0_5, %c0_6] : memref<6x32xf32, #tpu.memory_space<vmem>>, vector<1x32xf32>
    %11 = vector.shape_cast %10 : vector<1x32xf32> to vector<32xf32>
    %c1_7 = arith.constant 1 : index
    %c0_8 = arith.constant 0 : index
    %12 = vector.load %arg3[%c1_7, %c0_8] : memref<6x32xf32, #tpu.memory_space<vmem>>, vector<1x32xf32>
    %13 = vector.shape_cast %12 : vector<1x32xf32> to vector<32xf32>
    %c2_9 = arith.constant 2 : index
    %c0_10 = arith.constant 0 : index
    %14 = vector.load %arg3[%c2_9, %c0_10] : memref<6x32xf32, #tpu.memory_space<vmem>>, vector<1x32xf32>
    %15 = vector.shape_cast %14 : vector<1x32xf32> to vector<32xf32>
    %c3_11 = arith.constant 3 : index
    %c0_12 = arith.constant 0 : index
    %16 = vector.load %arg3[%c3_11, %c0_12] : memref<6x32xf32, #tpu.memory_space<vmem>>, vector<1x32xf32>
    %17 = vector.shape_cast %16 : vector<1x32xf32> to vector<32xf32>
    %c4_13 = arith.constant 4 : index
    %c0_14 = arith.constant 0 : index
    %18 = vector.load %arg3[%c4_13, %c0_14] : memref<6x32xf32, #tpu.memory_space<vmem>>, vector<1x32xf32>
    %19 = vector.shape_cast %18 : vector<1x32xf32> to vector<32xf32>
    %c5 = arith.constant 5 : index
    %c0_15 = arith.constant 0 : index
    %20 = vector.load %arg3[%c5, %c0_15] : memref<6x32xf32, #tpu.memory_space<vmem>>, vector<1x32xf32>
    %21 = vector.shape_cast %20 : vector<1x32xf32> to vector<32xf32>
    %c0_16 = arith.constant 0 : index
    %c0_17 = arith.constant 0 : index
    %22 = vector.load %arg4[%c0_16, %c0_17] : memref<1x8xf32, #tpu.memory_space<vmem>>, vector<1x8xf32>
    %23 = vector.shape_cast %22 : vector<1x8xf32> to vector<8xf32>
    %c0_18 = arith.constant 0 : index
    %c0_19 = arith.constant 0 : index
    %c0_20 = arith.constant 0 : index
    %24 = vector.load %arg1[%c0_18, %c0_19, %c0_20] : memref<1x8x16xf32, #tpu.memory_space<vmem>>, vector<1x8x16xf32>
    %25 = vector.shape_cast %24 : vector<1x8x16xf32> to vector<8x16xf32>
    %cst = arith.constant dense<0.000000e+00> : vector<8xf32>
    %26 = vector.multi_reduction <add>, %25, %cst [1] : vector<8x16xf32> to vector<8xf32>
    %27 = vector.shape_cast %26 : vector<8xf32> to vector<8x1xf32>
    %cst_21 = arith.constant 1.600000e+01 : f32
    %28 = vector.broadcast %cst_21 : f32 to vector<8x1xf32>
    %29 = arith.divf %27, %28 : vector<8x1xf32>
    %30 = vector.broadcast %29 : vector<8x1xf32> to vector<8x16xf32>
    %31 = arith.subf %25, %30 : vector<8x16xf32>
    %32 = arith.mulf %31, %31 : vector<8x16xf32>
    %cst_22 = arith.constant dense<0.000000e+00> : vector<8xf32>
    %33 = vector.multi_reduction <add>, %32, %cst_22 [1] : vector<8x16xf32> to vector<8xf32>
    %34 = vector.shape_cast %33 : vector<8xf32> to vector<8x1xf32>
    %cst_23 = arith.constant 1.600000e+01 : f32
    %35 = vector.broadcast %cst_23 : f32 to vector<8x1xf32>
    %36 = arith.divf %34, %35 : vector<8x1xf32>
    %37 = vector.broadcast %29 : vector<8x1xf32> to vector<8x16xf32>
    %38 = arith.subf %25, %37 : vector<8x16xf32>
    %cst_24 = arith.constant 9.99999974E-6 : f32
    %39 = vector.broadcast %cst_24 : f32 to vector<8x1xf32>
    %40 = arith.addf %36, %39 : vector<8x1xf32>
    %41 = math.rsqrt %40 : vector<8x1xf32>
    %42 = vector.broadcast %41 : vector<8x1xf32> to vector<8x16xf32>
    %43 = arith.mulf %38, %42 : vector<8x16xf32>
    %44 = vector.shape_cast %1 : vector<16xf32> to vector<1x16xf32>
    %45 = vector.broadcast %44 : vector<1x16xf32> to vector<8x16xf32>
    %46 = arith.mulf %43, %45 : vector<8x16xf32>
    %47 = vector.shape_cast %3 : vector<16xf32> to vector<1x16xf32>
    %48 = vector.broadcast %47 : vector<1x16xf32> to vector<8x16xf32>
    %49 = arith.addf %46, %48 : vector<8x16xf32>
    %50 = tpu.transpose %49, [1, 0] : vector<8x16xf32> -> vector<16x8xf32>
    %51 = arith.truncf %50 : vector<16x8xf32> to vector<16x8xbf16>
    %c0_25 = arith.constant 0 : index
    %c0_26 = arith.constant 0 : index
    %52 = vector.load %arg5[%c0_25, %c0_26] : memref<8x32xbf16, #tpu.memory_space<vmem>>, vector<8x32xbf16>
    %cst_27 = arith.constant dense<0.000000e+00> : vector<16x32xf32>
    %53 = tpu.matmul %51, %52, %cst_27 {dimension_numbers = #tpu.dot_dimension_numbers<[1], [0], [0], [1], [0, 0, 1, 1], [], []>} : vector<16x8xbf16>, vector<8x32xbf16>, vector<16x32xf32> -> vector<16x32xf32>
    %54 = vector.shape_cast %11 : vector<32xf32> to vector<1x32xf32>
    %55 = vector.broadcast %54 : vector<1x32xf32> to vector<16x32xf32>
    %56 = arith.addf %53, %55 : vector<16x32xf32>
    %cst_28 = arith.constant 5.000000e-01 : f32
    %57 = vector.broadcast %cst_28 : f32 to vector<16x32xf32>
    %58 = arith.mulf %57, %56 : vector<16x32xf32>
    %cst_29 = arith.constant 0.707106769 : f32
    %59 = vector.broadcast %cst_29 : f32 to vector<16x32xf32>
    %60 = arith.mulf %56, %59 : vector<16x32xf32>
    %61 = math.erf %60 : vector<16x32xf32>
    %cst_30 = arith.constant 1.000000e+00 : f32
    %62 = vector.broadcast %cst_30 : f32 to vector<16x32xf32>
    %63 = arith.addf %62, %61 : vector<16x32xf32>
    %64 = arith.mulf %58, %63 : vector<16x32xf32>
    %cst_31 = arith.constant dense<0.000000e+00> : vector<16xf32>
    %65 = vector.multi_reduction <add>, %64, %cst_31 [1] : vector<16x32xf32> to vector<16xf32>
    %66 = vector.shape_cast %65 : vector<16xf32> to vector<16x1xf32>
    %cst_32 = arith.constant 3.200000e+01 : f32
    %67 = vector.broadcast %cst_32 : f32 to vector<16x1xf32>
    %68 = arith.divf %66, %67 : vector<16x1xf32>
    %69 = vector.broadcast %68 : vector<16x1xf32> to vector<16x32xf32>
    %70 = arith.subf %64, %69 : vector<16x32xf32>
    %71 = arith.mulf %70, %70 : vector<16x32xf32>
    %cst_33 = arith.constant dense<0.000000e+00> : vector<16xf32>
    %72 = vector.multi_reduction <add>, %71, %cst_33 [1] : vector<16x32xf32> to vector<16xf32>
    %73 = vector.shape_cast %72 : vector<16xf32> to vector<16x1xf32>
    %cst_34 = arith.constant 3.200000e+01 : f32
    %74 = vector.broadcast %cst_34 : f32 to vector<16x1xf32>
    %75 = arith.divf %73, %74 : vector<16x1xf32>
    %76 = vector.broadcast %68 : vector<16x1xf32> to vector<16x32xf32>
    %77 = arith.subf %64, %76 : vector<16x32xf32>
    %cst_35 = arith.constant 9.99999974E-6 : f32
    %78 = vector.broadcast %cst_35 : f32 to vector<16x1xf32>
    %79 = arith.addf %75, %78 : vector<16x1xf32>
    %80 = math.rsqrt %79 : vector<16x1xf32>
    %81 = vector.broadcast %80 : vector<16x1xf32> to vector<16x32xf32>
    %82 = arith.mulf %77, %81 : vector<16x32xf32>
    %83 = vector.shape_cast %13 : vector<32xf32> to vector<1x32xf32>
    %84 = vector.broadcast %83 : vector<1x32xf32> to vector<16x32xf32>
    %85 = arith.mulf %82, %84 : vector<16x32xf32>
    %86 = vector.shape_cast %15 : vector<32xf32> to vector<1x32xf32>
    %87 = vector.broadcast %86 : vector<1x32xf32> to vector<16x32xf32>
    %88 = arith.addf %85, %87 : vector<16x32xf32>
    %89 = arith.truncf %88 : vector<16x32xf32> to vector<16x32xbf16>
    %c0_36 = arith.constant 0 : index
    %c0_37 = arith.constant 0 : index
    %90 = vector.load %arg6[%c0_36, %c0_37] : memref<32x8xbf16, #tpu.memory_space<vmem>>, vector<32x8xbf16>
    %cst_38 = arith.constant dense<0.000000e+00> : vector<16x8xf32>
    %91 = tpu.matmul %89, %90, %cst_38 {dimension_numbers = #tpu.dot_dimension_numbers<[1], [0], [0], [1], [0, 0, 1, 1], [], []>} : vector<16x32xbf16>, vector<32x8xbf16>, vector<16x8xf32> -> vector<16x8xf32>
    %92 = vector.shape_cast %23 : vector<8xf32> to vector<1x8xf32>
    %93 = vector.broadcast %92 : vector<1x8xf32> to vector<16x8xf32>
    %94 = arith.addf %91, %93 : vector<16x8xf32>
    %95 = tpu.transpose %94, [1, 0] : vector<16x8xf32> -> vector<8x16xf32>
    %c0_39 = arith.constant 0 : index
    %c0_40 = arith.constant 0 : index
    %c0_41 = arith.constant 0 : index
    %96 = vector.load %arg1[%c0_39, %c0_40, %c0_41] : memref<1x8x16xf32, #tpu.memory_space<vmem>>, vector<1x8x16xf32>
    %97 = vector.shape_cast %96 : vector<1x8x16xf32> to vector<8x16xf32>
    %98 = arith.addf %97, %95 : vector<8x16xf32>
    %cst_42 = arith.constant dense<0.000000e+00> : vector<8xf32>
    %99 = vector.multi_reduction <add>, %98, %cst_42 [1] : vector<8x16xf32> to vector<8xf32>
    %100 = vector.shape_cast %99 : vector<8xf32> to vector<8x1xf32>
    %cst_43 = arith.constant 1.600000e+01 : f32
    %101 = vector.broadcast %cst_43 : f32 to vector<8x1xf32>
    %102 = arith.divf %100, %101 : vector<8x1xf32>
    %103 = vector.broadcast %102 : vector<8x1xf32> to vector<8x16xf32>
    %104 = arith.subf %98, %103 : vector<8x16xf32>
    %105 = arith.mulf %104, %104 : vector<8x16xf32>
    %cst_44 = arith.constant dense<0.000000e+00> : vector<8xf32>
    %106 = vector.multi_reduction <add>, %105, %cst_44 [1] : vector<8x16xf32> to vector<8xf32>
    %107 = vector.shape_cast %106 : vector<8xf32> to vector<8x1xf32>
    %cst_45 = arith.constant 1.600000e+01 : f32
    %108 = vector.broadcast %cst_45 : f32 to vector<8x1xf32>
    %109 = arith.divf %107, %108 : vector<8x1xf32>
    %110 = vector.broadcast %102 : vector<8x1xf32> to vector<8x16xf32>
    %111 = arith.subf %98, %110 : vector<8x16xf32>
    %cst_46 = arith.constant 9.99999974E-6 : f32
    %112 = vector.broadcast %cst_46 : f32 to vector<8x1xf32>
    %113 = arith.addf %109, %112 : vector<8x1xf32>
    %114 = math.rsqrt %113 : vector<8x1xf32>
    %115 = vector.broadcast %114 : vector<8x1xf32> to vector<8x16xf32>
    %116 = arith.mulf %111, %115 : vector<8x16xf32>
    %117 = vector.shape_cast %5 : vector<16xf32> to vector<1x16xf32>
    %118 = vector.broadcast %117 : vector<1x16xf32> to vector<8x16xf32>
    %119 = arith.mulf %116, %118 : vector<8x16xf32>
    %120 = vector.shape_cast %7 : vector<16xf32> to vector<1x16xf32>
    %121 = vector.broadcast %120 : vector<1x16xf32> to vector<8x16xf32>
    %122 = arith.addf %119, %121 : vector<8x16xf32>
    %123 = arith.truncf %122 : vector<8x16xf32> to vector<8x16xbf16>
    %c0_47 = arith.constant 0 : index
    %c0_48 = arith.constant 0 : index
    %124 = vector.load %arg7[%c0_47, %c0_48] : memref<16x32xbf16, #tpu.memory_space<vmem>>, vector<16x32xbf16>
    %cst_49 = arith.constant dense<0.000000e+00> : vector<8x32xf32>
    %125 = tpu.matmul %123, %124, %cst_49 {dimension_numbers = #tpu.dot_dimension_numbers<[1], [0], [0], [1], [0, 0, 1, 1], [], []>} : vector<8x16xbf16>, vector<16x32xbf16>, vector<8x32xf32> -> vector<8x32xf32>
    %126 = vector.shape_cast %17 : vector<32xf32> to vector<1x32xf32>
    %127 = vector.broadcast %126 : vector<1x32xf32> to vector<8x32xf32>
    %128 = arith.addf %125, %127 : vector<8x32xf32>
    %cst_50 = arith.constant 5.000000e-01 : f32
    %129 = vector.broadcast %cst_50 : f32 to vector<8x32xf32>
    %130 = arith.mulf %129, %128 : vector<8x32xf32>
    %cst_51 = arith.constant 0.707106769 : f32
    %131 = vector.broadcast %cst_51 : f32 to vector<8x32xf32>
    %132 = arith.mulf %128, %131 : vector<8x32xf32>
    %133 = math.erf %132 : vector<8x32xf32>
    %cst_52 = arith.constant 1.000000e+00 : f32
    %134 = vector.broadcast %cst_52 : f32 to vector<8x32xf32>
    %135 = arith.addf %134, %133 : vector<8x32xf32>
    %136 = arith.mulf %130, %135 : vector<8x32xf32>
    %cst_53 = arith.constant dense<0.000000e+00> : vector<8xf32>
    %137 = vector.multi_reduction <add>, %136, %cst_53 [1] : vector<8x32xf32> to vector<8xf32>
    %138 = vector.shape_cast %137 : vector<8xf32> to vector<8x1xf32>
    %cst_54 = arith.constant 3.200000e+01 : f32
    %139 = vector.broadcast %cst_54 : f32 to vector<8x1xf32>
    %140 = arith.divf %138, %139 : vector<8x1xf32>
    %141 = vector.broadcast %140 : vector<8x1xf32> to vector<8x32xf32>
    %142 = arith.subf %136, %141 : vector<8x32xf32>
    %143 = arith.mulf %142, %142 : vector<8x32xf32>
    %cst_55 = arith.constant dense<0.000000e+00> : vector<8xf32>
    %144 = vector.multi_reduction <add>, %143, %cst_55 [1] : vector<8x32xf32> to vector<8xf32>
    %145 = vector.shape_cast %144 : vector<8xf32> to vector<8x1xf32>
    %cst_56 = arith.constant 3.200000e+01 : f32
    %146 = vector.broadcast %cst_56 : f32 to vector<8x1xf32>
    %147 = arith.divf %145, %146 : vector<8x1xf32>
    %148 = vector.broadcast %140 : vector<8x1xf32> to vector<8x32xf32>
    %149 = arith.subf %136, %148 : vector<8x32xf32>
    %cst_57 = arith.constant 9.99999974E-6 : f32
    %150 = vector.broadcast %cst_57 : f32 to vector<8x1xf32>
    %151 = arith.addf %147, %150 : vector<8x1xf32>
    %152 = math.rsqrt %151 : vector<8x1xf32>
    %153 = vector.broadcast %152 : vector<8x1xf32> to vector<8x32xf32>
    %154 = arith.mulf %149, %153 : vector<8x32xf32>
    %155 = vector.shape_cast %19 : vector<32xf32> to vector<1x32xf32>
    %156 = vector.broadcast %155 : vector<1x32xf32> to vector<8x32xf32>
    %157 = arith.mulf %154, %156 : vector<8x32xf32>
    %158 = vector.shape_cast %21 : vector<32xf32> to vector<1x32xf32>
    %159 = vector.broadcast %158 : vector<1x32xf32> to vector<8x32xf32>
    %160 = arith.addf %157, %159 : vector<8x32xf32>
    %161 = arith.truncf %160 : vector<8x32xf32> to vector<8x32xbf16>
    %c0_58 = arith.constant 0 : index
    %c0_59 = arith.constant 0 : index
    %162 = vector.load %arg8[%c0_58, %c0_59] : memref<32x16xbf16, #tpu.memory_space<vmem>>, vector<32x16xbf16>
    %cst_60 = arith.constant dense<0.000000e+00> : vector<8x16xf32>
    %163 = tpu.matmul %161, %162, %cst_60 {dimension_numbers = #tpu.dot_dimension_numbers<[1], [0], [0], [1], [0, 0, 1, 1], [], []>} : vector<8x32xbf16>, vector<32x16xbf16>, vector<8x16xf32> -> vector<8x16xf32>
    %164 = vector.shape_cast %9 : vector<16xf32> to vector<1x16xf32>
    %165 = vector.broadcast %164 : vector<1x16xf32> to vector<8x16xf32>
    %166 = arith.addf %163, %165 : vector<8x16xf32>
    %167 = arith.addf %166, %98 : vector<8x16xf32>
    %168 = vector.shape_cast %167 : vector<8x16xf32> to vector<1x8x16xf32>
    %c0_61 = arith.constant 0 : index
    %c0_62 = arith.constant 0 : index
    %c0_63 = arith.constant 0 : index
    %169 = vector.load %arg9[%c0_61, %c0_62, %c0_63] : memref<1x8x16xf32, #tpu.memory_space<vmem>>, vector<1x8x16xf32>
    tpu.vector_store %arg9[%c0_61, %c0_62, %c0_63], %168 {strides = array<i32>} : memref<1x8x16xf32, #tpu.memory_space<vmem>>, vector<1x8x16xf32>,
    return
  }
  func.func @transform_0(%arg0: i32) -> (i32, i32, i32) {
    %c0_i32 = arith.constant 0 : i32
    %c0_i32_0 = arith.constant 0 : i32
    %c0_i32_1 = arith.constant 0 : i32
    return %arg0, %c0_i32, %c0_i32_0 : i32, i32, i32
  }
  func.func @transform_1(%arg0: i32) -> (i32, i32) {
    %c0_i32 = arith.constant 0 : i32
    %c0_i32_0 = arith.constant 0 : i32
    %c0_i32_1 = arith.constant 0 : i32
    return %c0_i32, %c0_i32_0 : i32, i32
  }
  func.func @transform_2(%arg0: i32) -> (i32, i32) {
    %c0_i32 = arith.constant 0 : i32
    %c0_i32_0 = arith.constant 0 : i32
    %c0_i32_1 = arith.constant 0 : i32
    return %c0_i32, %c0_i32_0 : i32, i32
  }
  func.func @transform_3(%arg0: i32) -> (i32, i32) {
    %c0_i32 = arith.constant 0 : i32
    %c0_i32_0 = arith.constant 0 : i32
    %c0_i32_1 = arith.constant 0 : i32
    return %c0_i32, %c0_i32_0 : i32, i32
  }
  func.func @transform_4(%arg0: i32) -> (i32, i32) {
    %c0_i32 = arith.constant 0 : i32
    %c0_i32_0 = arith.constant 0 : i32
    %c0_i32_1 = arith.constant 0 : i32
    return %c0_i32, %c0_i32_0 : i32, i32
  }
  func.func @transform_5(%arg0: i32) -> (i32, i32) {
    %c0_i32 = arith.constant 0 : i32
    %c0_i32_0 = arith.constant 0 : i32
    %c0_i32_1 = arith.constant 0 : i32
    return %c0_i32, %c0_i32_0 : i32, i32
  }
  func.func @transform_6(%arg0: i32) -> (i32, i32) {
    %c0_i32 = arith.constant 0 : i32
    %c0_i32_0 = arith.constant 0 : i32
    %c0_i32_1 = arith.constant 0 : i32
    return %c0_i32, %c0_i32_0 : i32, i32
  }
  func.func @transform_7(%arg0: i32) -> (i32, i32) {
    %c0_i32 = arith.constant 0 : i32
    %c0_i32_0 = arith.constant 0 : i32
    %c0_i32_1 = arith.constant 0 : i32
    return %c0_i32, %c0_i32_0 : i32, i32
  }
  func.func @transform_8(%arg0: i32) -> (i32, i32, i32) {
    %c0_i32 = arith.constant 0 : i32
    %c0_i32_0 = arith.constant 0 : i32
    %c0_i32_1 = arith.constant 0 : i32
    return %arg0, %c0_i32, %c0_i32_0 : i32, i32, i32
  }
}

</mosaic_0001>

<bundles_post_ra>
// kernel: tpu_custom_call.1
= control target key start
LH: loop header
LB: loop body
LE: loop exit
PB: predicated region body
PF: predicated region fallthrough
CT: control target
= control target key end

     0   :  { %13 = vsyncpa [#allocation3], 0  ;;  %s1258_s0 = inlined_call_operand.vmem [shape: f32[2,8,16], index: 0, kind: input, shape index: {}]   ;;  %s1259_s1 = inlined_call_operand.vmem [shape: f32[5,16], index: 1, kind: input, shape index: {}]   ;;  %s1260_s2 = inlined_call_operand.vmem [shape: f32[6,32], index: 2, kind: input, shape index: {}]   ;;  %s1261_s3 = inlined_call_operand.vmem [shape: f32[1,8], index: 3, kind: input, shape index: {}]   ;;  %s1262_s4 = inlined_call_operand.vmem [shape: bf16[8,32], index: 4, kind: input, shape index: {}]   ;;  %s1263_s5 = inlined_call_operand.vmem [shape: bf16[32,8], index: 5, kind: input, shape index: {}]   ;;  %s1264_s6 = inlined_call_operand.vmem [shape: bf16[16,32], index: 6, kind: input, shape index: {}]   ;;  %s1265_s7 = inlined_call_operand.vmem [shape: bf16[32,16], index: 7, kind: input, shape index: {}]   ;;  %s1266_s8 = inlined_call_operand.hbm [shape: f32[2,8,16], index: 8, kind: output, shape index: {}]  }
   0x1   :  { %15 = vsyncpa [#allocation3 + $0x1], 0  ;;  %s1066_s27 = smov 0   ;;  %s1068_s28 = smov 0  }
   0x2   :  { %s1070_s29 = smov 0   ;;  %s1072_s30 = smov 0  }
   0x3 LB: > { %s1087_s9 = sadd.s32 4294967295, %s1016_s30   ;;  %s823_s10 = sadd.s32 4294967294, %s1016_s30   ;;  %s1016_s30 = sphi %s1072_s30, %s1272_s30   ;;  %s1012_s29 = sphi %s1070_s29, %s1271_s29   ;;  %s1008_s28 = sphi %s1068_s28, %s1270_s28   ;;  %s1004_s27 = sphi %s1066_s27, %s1269_s27  }
   0x4   : > { %s1091_s11 = sadd.s32 1, %s1016_s30   ;;  %s201_s12 = sadd.s32 1, %s1012_s29 }
   0x5   : > { %s198_s13 = ssub.s32 %s1016_s30, %s1091_s11  ;;  %p211_p0 = scmp.ne.s32.totalorder %s1012_s29, %s1008_s28 }
   0x6   : > { %p199_p1 = scmp.eq.s32.totalorder %s198_s13, 0  ;;  %p212_p2 = scmp.eq.s32.totalorder %s1087_s9, 1 }
   0x7   : > { %p217_p3 = scmp.ne.s32.totalorder %s1008_s28, %s1004_s27  ;;  %p218_p4 = scmp.eq.s32.totalorder %s823_s10, 1 }
   0x8   : > { %s1102_s14 = scalar_select %p199_p1, %s1012_s29, %s201_s12  }
   0x9   : > { %p1104_p5 = por %p212_p2, %p211_p0  ;;  %p1108_p6 = por %p218_p4, %p217_p3 }
   0xa   : > { %p826_p7 = scmp.ge.s32.totalorder %s1016_s30, 1  ;;  %p264_p8 = scmp.lt.s32.totalorder %s1016_s30, 3 }
   0xc   : > { %p265_p9 = pnand %p826_p7, %p264_p8 }
   0xd   : > { %p297_p10 = scmp.lt.s32.totalorder (!%p265_p9), %s1087_s9, 1  ;;  %vm315_vm0 = vcmask (!%p265_p9), 130048   ;;  %v829_v11 = vld [vmem:[%s1259_s1] ss:$0 sm:$0xff] (!%p265_p9)  ;;  %v830_v13 = vld [vmem:[%s1259_s1 + $0x1] ss:$0 sm:$0xff] (!%p265_p9) }
   0xe   : > { %268 = sbr.rel (%p265_p9) target bundleno = 2460 (0x99c), region = 52  ;;  %v373_v16 = vld [vmem:[%s1262_s4] sm:$0xf] (!%p265_p9)  ;;  %vm382_vm1 = vcmask (!%p265_p9), 1043456   ;;  %v1018_v17 = vmov (!%p265_p9), 0.0   ;;  %vm1019_vm2 = vmmov (!%p265_p9), 0  }
   0xf   : > { %864 = vmatprep.subr.bf16.mxu0 (!%p265_p9), %v1018_v17  ;;  %v384_v18 = vsel (!%p265_p9), %vm382_vm1, %v373_v16, 0  ;;  %870 = vmatprep.subr.bf16.mxu1 (!%p265_p9), %v1018_v17  ;;  %vm378_vm3 = vcmask (!%p265_p9), 64512   ;;  %v831_v22 = vld [vmem:[%s1260_s2] ss:$0 sm:$0xff] (!%p265_p9)  ;;  %vm437_vm4 = vcmask (!%p265_p9), 261120   ;;  %v934_v52 = vld [vmem:[%s1263_s5 + $0x8] sm:$0xff] (!%p265_p9)  }
  0x10   : > { %865 = vmatpush3.bf16.msra.mxu0 (!%p265_p9), %v384_v18  ;;  %866 = vmatprep.mubr.msk.bf16.mxu0 (!%p265_p9), %vm1019_vm2, %v1018_v17  ;;  %v933_v51 = vld [vmem:[%s1263_s5] sm:$0xff] (!%p265_p9)   ;;  %s1020_s12 = smov (!%p265_p9), [#allocation2]  }
  0x11   : > { %878 = vmatprep.subr.bf16.mxu0 (!%p265_p9), %v1018_v17  ;;  %874 = vmatprep.mubr.msk.bf16.mxu1 (!%p265_p9), %vm1019_vm2, %v1018_v17  ;;  %v833_v61 = vld [vmem:[%s1260_s2 + $0x1] ss:$0 sm:$0xff] (!%p265_p9)  ;;  %s958_s13 = sshll.u32 (!%p265_p9), %s1020_s12, 4  ;;  %s959_s13 = int_to_ptr.vmem [resolvable:$false] %s958_s13 }
  0x12   : > { %871 = vmatpush3.bf16.msra.mxu1 (!%p265_p9), %v933_v51  ;;  %v937_v51 = vld [vmem:[%s1265_s7 + $0x8] sm:$0xff] (!%p265_p9)  }
  0x13   : > { %872 = vmatprep.subr.bf16.mxu1 (!%p265_p9), %v1018_v17 }
  0x15   : > { %s298_s17 = scalar_select %p297_p10, %s1087_s9, 1 }
  0x16   : > { %873 = vmatpush3.bf16.msra.mxu1 %v934_v52 }
  0x17   : > { %s828_s18 = sshll.u32 %s298_s17, 3  ;;  %884 = vmatprep.subr.bf16.mxu1 %v1018_v17  ;;  %s294_s17 = sand.u32 1, %s1008_s28  }
  0x18   : > { %s300_s21 = scalar_lea.vmem %s1258_s0, %s828_s18  ;;  %s827_s18 = sshll.u32 %s294_s17, 3 }
  0x19   : > { %v1119_v0 = vld [vmem:[%s300_s21] sm:$0xff]  ;;  %s851_s21 = sshll.u32 %s1087_s9, 7  ;;  %s296_s22 = scalar_lea.vmem [#allocation2], %s827_s18 }
  0x1a   : > { %v316_v1 = vsel %vm315_vm0, %v1119_v0, 0.0  ;;  %s764_s23 = sshll.u32 %s296_s22, 4  ;;  %s1215_s26 = scalar_lea.hbm %s1266_s8, %s851_s21  ;;  %s1217_s23 = int_to_ptr.vmem [resolvable:$true] %s764_s23 }
  0x1b   : > { %317 = vadd.xlane.f32.xlu0 %v316_v1  ;;  %s751_s9 = scalar_lea.sflag [#allocation3], %s294_s17  ;;  %s954_s10 = scalar_lea.vmem %s1217_s23, 128 }
  0x1c   : > { %p955_p11 = scmp.ne.s32.totalorder %s1217_s23, %s954_s10  ;;  %s960_s18 = scalar_lea.vmem %s959_s13, 256 }
  0x1d   : > { %p961_p0 = scmp.lt.s32.totalorder %s1217_s23, %s959_s13  ;;  %p962_p1 = scmp.lt.s32.totalorder %s960_s18, %s954_s10 }
  0x1e   : > { %p956_p12 = pnand %p955_p11, %p1104_p5 }
  0x1f   : > { %p963_p2 = por %p962_p1, %p961_p0 }
  0x20   : > { %p957_p13 = pneg %p956_p12 }
  0x22   : > { %p964_p3 = pnand %p963_p2, %p957_p13 }
  0xa8   : > { %v318_v2 = vpop.xlane.xlu0 %317 }
  0xa9   : > { %v320_v3 = vmul.f32 0.0625, %v318_v2  ;;  %v834_v2 = vld [vmem:[%s1260_s2 + $0x2] ss:$0 sm:$0xff] }
  0xab   : > { %v321_v4 = vsub.f32 %v1119_v0, %v320_v3 }
  0xad   : > { %v322_v5 = vmul.f32 %v321_v4, %v321_v4 }
  0xaf   : > { %v323_v6 = vsel %vm315_vm0, %v322_v5, 0.0 }
  0xb0   : > { %324 = vadd.xlane.f32.xlu0 %v323_v6 }
 0x13d   : > { %v325_v7 = vpop.xlane.xlu0 %324 }
 0x13e   : > { %v326_v8 = vmul.f32 0.0625, %v325_v7  ;;  %v835_v7 = vld [vmem:[%s1261_s3] ss:$0 sm:$0xff] }
 0x140   : > { %v327_v9 = vadd.f32 1e-05, %v326_v8 }
 0x142   : > { %938 = vrsqrt.f32 %v327_v9 }
 0x14c   : > { %v939_v10 = vpop.eup %938 }
 0x14d   : > { %v329_v12 = vmul.f32 %v939_v10, %v321_v4 }
 0x14f   : > { %v334_v14 = vmul.f32 %v829_v11, %v329_v12 }
 0x151   : > { %v339_v15 = vadd.f32 %v830_v13, %v334_v14 }
 0x153   : > { %340 = vxpose.xlu1.b32.start.end [1/1] (short) (narrow) %v339_v15, 16 }
 0x1d3   : > { %v356_v19 = vpop.trf.xlu1 }
 0x1d7   : > { %v357_v20 = vpop.trf.xlu1 }
 0x1d8   : > { %v372_v21 = vpack.c.bf16 %v357_v20, %v356_v19 }
 0x1da   : > { %867 = vmatmul.mubr.msk.bf16.vlgmr.msra.gmra.mrb[0].mxu0 %vm378_vm3, %v372_v21 }
 0x1db   : > { %880 = vmatprep.mubr.msk.bf16.mxu0 %vm1019_vm2, %v1018_v17 }
 0x2ad   : > { %v420_v23 = vpop.f32.mrb[0].mxu0 }
 0x2ae   : > { %v421_v24 = vadd.f32 %v831_v22, %v420_v23  ;;  %v868_v25 = vpop.f32.mrb[1].mxu0  ;;  %v935_v23 = vld [vmem:[%s1264_s6] sm:$0xff]  }
 0x2af   : > { %v423_v26 = vpop.f32.mrb[2].mxu0  ;;  %879 = vmatpush3.bf16.msra.mxu0 %v935_v23 }
 0x2b0   : > { %v429_v27 = vmul.f32 0.70710677, %v421_v24  ;;  %v424_v28 = vadd.f32 %v831_v22, %v423_v26  ;;  %v869_v29 = vpop.f32.mrb[3].mxu0  ;;  %v427_v32 = vmul.f32 0.5, %v421_v24 }
 0x2b1   : > { %v840_v29 = vld [vmem:[%s1259_s1 + $0x3] ss:$0 sm:$0xff] }
 0x2b2   : > { %940 = verf.f32 %v429_v27  ;;  %v430_v30 = vmul.f32 0.70710677, %v424_v28  ;;  %v428_v35 = vmul.f32 0.5, %v424_v28  ;;  %v839_v27 = vld [vmem:[%s1259_s1 + $0x2] ss:$0 sm:$0xff] }
 0x2b4   : > { %942 = verf.f32 %v430_v30 }
 0x2bc   : > { %v941_v31 = vpop.eup %940 }
 0x2bd   : > { %v433_v33 = vadd.f32 1.0, %v941_v31 }
 0x2be   : > { %v943_v34 = vpop.eup %942 }
 0x2bf   : > { %v435_v36 = vmul.f32 %v433_v33, %v427_v32  ;;  %v434_v37 = vadd.f32 1.0, %v943_v34  ;;  %v841_v33 = vld [vmem:[%s1260_s2 + $0x3] ss:$0 sm:$0xff] }
 0x2c1   : > { %v438_v38 = vsel %vm437_vm4, %v435_v36, 0.0  ;;  %v436_v39 = vmul.f32 %v434_v37, %v428_v35 }
 0x2c2   : > { %439 = vadd.xlane.f32.xlu1 %v438_v38 }
 0x2c3   : > { %v441_v40 = vsel %vm437_vm4, %v436_v39, 0.0 }
 0x2c4   : > { %442 = vadd.xlane.f32.xlu0 %v441_v40 }
 0x34f   : > { %v440_v41 = vpop.xlane.xlu1 %439 }
 0x350   : > { %v445_v42 = vmul.f32 0.03125, %v440_v41 }
 0x351   : > { %v443_v43 = vpop.xlane.xlu0 %442 }
 0x352   : > { %v447_v44 = vsub.f32 %v435_v36, %v445_v42  ;;  %v446_v45 = vmul.f32 0.03125, %v443_v43 }
 0x354   : > { %v448_v46 = vsub.f32 %v436_v39, %v446_v45  ;;  %v449_v47 = vmul.f32 %v447_v44, %v447_v44 }
 0x356   : > { %v451_v48 = vsel %vm437_vm4, %v449_v47, 0.0  ;;  %v450_v49 = vmul.f32 %v448_v46, %v448_v46 }
 0x357   : > { %452 = vadd.xlane.f32.xlu0 %v451_v48 }
 0x358   : > { %v454_v50 = vsel %vm437_vm4, %v450_v49, 0.0 }
 0x35b   : > { %455 = vadd.xlane.f32.xlu0 %v454_v50  ;;  %v936_v50 = vld [vmem:[%s1265_s7] sm:$0xff]  }
 0x3e4   : > { %v453_v53 = vpop.xlane.xlu0 %452 }
 0x3e5   : > { %v457_v54 = vmul.f32 0.03125, %v453_v53 }
 0x3e7   : > { %v459_v55 = vadd.f32 1e-05, %v457_v54 }
 0x3e8   : > { %v456_v56 = vpop.xlane.xlu0 %455 }
 0x3e9   : > { %944 = vrsqrt.f32 %v459_v55  ;;  %v458_v57 = vmul.f32 0.03125, %v456_v56  ;;  %v844_v56 = vld [vmem:[%s1260_s2 + $0x4] ss:$0 sm:$0xff] }
 0x3eb   : > { %v460_v58 = vadd.f32 1e-05, %v458_v57 }
 0x3ed   : > { %946 = vrsqrt.f32 %v460_v58 }
 0x3f3   : > { %v945_v59 = vpop.eup %944 }
 0x3f4   : > { %v463_v60 = vmul.f32 %v945_v59, %v447_v44 }
 0x3f6   : > { %v469_v1 = vmul.f32 %v833_v61, %v463_v60 }
 0x3f7   : > { %v947_v62 = vpop.eup %946 }
 0x3f8   : > { %v464_v63 = vmul.f32 %v947_v62, %v448_v46  ;;  %v475_v4 = vadd.f32 %v834_v2, %v469_v1 }
 0x3fa   : > { %v470_v3 = vmul.f32 %v833_v61, %v464_v63  ;;  %v846_v61 = vld [vmem:[%s1259_s1 + $0x4] ss:$0 sm:$0xff] }
 0x3fc   : > { %v476_v5 = vadd.f32 %v834_v2, %v470_v3 }
 0x3fe   : > { %v477_v6 = vpack.c.bf16 %v476_v5, %v475_v4 }
 0x400   : > { %875 = vmatmul.mubr.msk.bf16.vlgmr.msra.gmra.mrb[0].mxu1 %vm437_vm4, %v477_v6 }
 0x401   : > { %888 = vmatprep.mubr.msk.bf16.mxu1 %vm1019_vm2, %v1018_v17  ;;  %885 = vmatpush3.bf16.msra.mxu1 %v936_v50 }
 0x402   : > { %886 = vmatprep.subr.bf16.mxu1 %v1018_v17  ;;  %v845_v17 = vld [vmem:[%s1260_s2 + $0x5] ss:$0 sm:$0xff] }
 0x405   : > { %887 = vmatpush3.bf16.msra.mxu1 %v937_v51 }
 0x4d3   : > { %v537_v8 = vpop.f32.mrb[0].mxu1 }
 0x4d4   : > { %v538_v9 = vadd.f32 %v835_v7, %v537_v8  ;;  %v876_v10 = vpop.f32.mrb[1].mxu1 }
 0x4d5   : > { %v540_v11 = vpop.f32.mrb[2].mxu1 }
 0x4d6   : > { %544 = vxpose.xlu0.b32.start [1/2] (short) (narrow) %v538_v9, 8  ;;  %v877_v12 = vpop.f32.mrb[3].mxu1  ;;  %v541_v13 = vadd.f32 %v835_v7, %v540_v11 }
 0x4da   : > { %545 = vxpose.xlu0.b32.end [2/2] (short) (narrow) %v541_v13, 8 }
 0x556   : > { %v560_v14 = vpop.trf.xlu0 }
 0x557   : > { %v1171_v15 = vadd.f32 %v560_v14, %v1119_v0 }
 0x559   : > { %v577_v16 = vsel %vm315_vm0, %v1171_v15, 0.0 }
 0x55a   : > { %578 = vadd.xlane.f32.xlu1 %v577_v16 }
 0x5e7   : > { %v579_v18 = vpop.xlane.xlu1 %578 }
 0x5e8   : > { %v580_v19 = vmul.f32 0.0625, %v579_v18 }
 0x5ea   : > { %v581_v20 = vsub.f32 %v1171_v15, %v580_v19 }
 0x5ec   : > { %v582_v21 = vmul.f32 %v581_v20, %v581_v20 }
 0x5ee   : > { %v583_v22 = vsel %vm315_vm0, %v582_v21, 0.0 }
 0x5ef   : > { %584 = vadd.xlane.f32.xlu1 %v583_v22 }
 0x67c   : > { %v585_v24 = vpop.xlane.xlu1 %584 }
 0x67d   : > { %v586_v0 = vmul.f32 0.0625, %v585_v24 }
 0x67f   : > { %v587_v25 = vadd.f32 1e-05, %v586_v0 }
 0x681   : > { %948 = vrsqrt.f32 %v587_v25 }
 0x68b   : > { %v949_v26 = vpop.eup %948 }
 0x68c   : > { %v589_v28 = vmul.f32 %v949_v26, %v581_v20 }
 0x68e   : > { %v594_v30 = vmul.f32 %v839_v27, %v589_v28 }
 0x690   : > { %v599_v31 = vadd.f32 %v840_v29, %v594_v30 }
 0x692   : > { %v600_v32 = vpack.c.bf16 %v599_v31, %v599_v31 }
 0x694   : > { %881 = vmatmul.mubr.msk.bf16.vlgmr.msra.gmra.mrb[4].mxu0 %vm315_vm0, %v600_v32 }
 0x767   : > { %v650_v34 = vpop.f32.mrb[4].mxu0 }
 0x768   : > { %v651_v35 = vadd.f32 %v841_v33, %v650_v34  ;;  %v882_v36 = vpop.f32.mrb[5].mxu0 }
 0x769   : > { %v653_v37 = vpop.f32.mrb[6].mxu0 }
 0x76a   : > { %v657_v38 = vmul.f32 0.70710677, %v651_v35  ;;  %v883_v39 = vpop.f32.mrb[7].mxu0  ;;  %v656_v41 = vmul.f32 0.5, %v651_v35 }
 0x76c   : > { %950 = verf.f32 %v657_v38 }
 0x776   : > { %v951_v40 = vpop.eup %950 }
 0x777   : > { %v659_v42 = vadd.f32 1.0, %v951_v40 }
 0x779   : > { %v660_v43 = vmul.f32 %v659_v42, %v656_v41 }
 0x77b   : > { %v661_v44 = vsel %vm437_vm4, %v660_v43, 0.0 }
 0x77c   : > { %662 = vadd.xlane.f32.xlu1 %v661_v44 }
 0x809   : > { %v663_v45 = vpop.xlane.xlu1 %662 }
 0x80a   : > { %v664_v46 = vmul.f32 0.03125, %v663_v45 }
 0x80c   : > { %v665_v47 = vsub.f32 %v660_v43, %v664_v46 }
 0x80e   : > { %v666_v48 = vmul.f32 %v665_v47, %v665_v47 }
 0x810   : > { %v667_v49 = vsel %vm437_vm4, %v666_v48, 0.0 }
 0x811   : > { %668 = vadd.xlane.f32.xlu1 %v667_v49 }
 0x89e   : > { %v669_v52 = vpop.xlane.xlu1 %668 }
 0x89f   : > { %v670_v53 = vmul.f32 0.03125, %v669_v52 }
 0x8a1   : > { %v671_v54 = vadd.f32 1e-05, %v670_v53 }
 0x8a3   : > { %952 = vrsqrt.f32 %v671_v54 }
 0x8ad   : > { %v953_v55 = vpop.eup %952 }
 0x8ae   : > { %v673_v57 = vmul.f32 %v953_v55, %v665_v47 }
 0x8b0   : > { %v678_v58 = vmul.f32 %v844_v56, %v673_v57 }
 0x8b2   : > { %v683_v59 = vadd.f32 %v845_v17, %v678_v58 }
 0x8b4   : > { %v684_v60 = vpack.c.bf16 %v683_v59, %v683_v59 }
 0x8b6   : > { %889 = vmatmul.mubr.msk.bf16.vlgmr.msra.gmra.mrb[4].mxu1 %vm437_vm4, %v684_v60 }
 0x989   : > { %v742_v62 = vpop.f32.mrb[4].mxu1 }
 0x98a   : > { %v743_v63 = vadd.f32 %v846_v61, %v742_v62  ;;  %v890_v1 = vpop.f32.mrb[5].mxu1 }
 0x98b   : > { %v745_v2 = vpop.f32.mrb[6].mxu1 }
 0x98c   : > { %v748_v3 = vadd.f32 %v743_v63, %v1171_v15  ;;  %v891_v4 = vpop.f32.mrb[7].mxu1 }
 0x98e   : > { %749 = vst.msk [vmem:[%s296_s22] sm:$0xff] %vm315_vm0, %v748_v3 }
 0x98f   : > { %967 = shalt.err (!%p964_p3)
}
 0x990   : > { %s968_s17 = scalar_lea.hbm %s1215_s26, 128  ;;  %s972_s21 = scalar_lea.hbm %s1266_s8, 256 }
 0x991   : > { %p969_p4 = scmp.ne.s32.totalorder %s1215_s26, %s968_s17  ;;  %p973_p9 = scmp.lt.u32.totalorder %s1215_s26, %s1266_s8 }
 0x992   : > { %p974_p10 = scmp.lt.u32.totalorder %s972_s21, %s968_s17  ;;  %p976_p12 = scmp.lt.u32.totalorder %s968_s17, %s1215_s26 }
 0x993   : > { %p970_p7 = pnand %p969_p4, %p1104_p5 }
 0x994   : > { %p975_p11 = por %p974_p10, %p973_p9 }
 0x995   : > { %p971_p8 = pneg %p970_p7 }
 0x996   : > { %p977_p13 = por %p976_p12, %p975_p11 }
 0x998   : > { %p978_p0 = pnand %p977_p13, %p971_p8 }
 0x99a   : > { %981 = shalt.err (!%p978_p0)
}
 0x99b   : > { %892 = dma.vmem_to_hbm [thread:$0]  (%p1104_p5), %s1217_s23, 128, %s1215_s26, %s751_s9  }
 0x99c PF: > { %p898_p1 = scmp.ge.s32.totalorder %s1016_s30, 2  ;;  %s776_s25 = sand.u32 1, %s1004_s27  }
 0x99d   : > { %s777_s10 = scalar_lea.sflag [#allocation3], %s776_s25 }
 0x99e   : > { %p895_p2 = pnand %p898_p1, %p1108_p6 }
 0x9a0   : > { %999 = dma.done.wait (!%p895_p2), %s777_s10, 128  }
 0x9a1   : > { %1001 = vsyncadd (!%p895_p2), %s777_s10, 4294967168  ;;  %p18_p3 = scmp.ge.s32.totalorder %s1091_s11, 4   ;;  %s1269_s27 = smov %s1008_s28 }
 0x9a2   : > { %s1270_s28 = smov %s1012_s29  ;;  %s1271_s29 = smov %s1102_s14 }
 0x9a3   : > { %s1272_s30 = smov %s1091_s11  ;;  %20 = sbr.rel (!%p18_p3) target bundleno = 3 (0x3), region = 87 }
 0x9aa   :  { %782 = vsyncpa [#allocation3], 1 }
 0x9ab   :  { %784 = vsyncpa [#allocation3 + $0x1], 1 }

// kernel: tpu_custom_call.1
= control target key start
LH: loop header
LB: loop body
LE: loop exit
PB: predicated region body
PF: predicated region fallthrough
CT: control target
= control target key end

     0   :  { %13 = vsyncpa [#allocation3], 0  ;;  %s1258_s0 = inlined_call_operand.vmem [shape: f32[2,8,16], index: 0, kind: input, shape index: {}]   ;;  %s1259_s1 = inlined_call_operand.vmem [shape: f32[5,16], index: 1, kind: input, shape index: {}]   ;;  %s1260_s2 = inlined_call_operand.vmem [shape: f32[6,32], index: 2, kind: input, shape index: {}]   ;;  %s1261_s3 = inlined_call_operand.vmem [shape: f32[1,8], index: 3, kind: input, shape index: {}]   ;;  %s1262_s4 = inlined_call_operand.vmem [shape: bf16[8,32], index: 4, kind: input, shape index: {}]   ;;  %s1263_s5 = inlined_call_operand.vmem [shape: bf16[32,8], index: 5, kind: input, shape index: {}]   ;;  %s1264_s6 = inlined_call_operand.vmem [shape: bf16[16,32], index: 6, kind: input, shape index: {}]   ;;  %s1265_s7 = inlined_call_operand.vmem [shape: bf16[32,16], index: 7, kind: input, shape index: {}]   ;;  %s1266_s8 = inlined_call_operand.hbm [shape: f32[2,8,16], index: 8, kind: output, shape index: {}]  }
   0x1   :  { %15 = vsyncpa [#allocation3 + $0x1], 0  ;;  %s1066_s27 = smov 0   ;;  %s1068_s28 = smov 0  }
   0x2   :  { %s1070_s29 = smov 0   ;;  %s1072_s30 = smov 0  }
   0x3 LB: > { %s1087_s9 = sadd.s32 4294967295, %s1016_s30   ;;  %s823_s10 = sadd.s32 4294967294, %s1016_s30   ;;  %s1016_s30 = sphi %s1072_s30, %s1272_s30   ;;  %s1012_s29 = sphi %s1070_s29, %s1271_s29   ;;  %s1008_s28 = sphi %s1068_s28, %s1270_s28   ;;  %s1004_s27 = sphi %s1066_s27, %s1269_s27  }
   0x4   : > { %s1091_s11 = sadd.s32 1, %s1016_s30   ;;  %s201_s12 = sadd.s32 1, %s1012_s29 }
   0x5   : > { %s198_s13 = ssub.s32 %s1016_s30, %s1091_s11  ;;  %p211_p0 = scmp.ne.s32.totalorder %s1012_s29, %s1008_s28 }
   0x6   : > { %p199_p1 = scmp.eq.s32.totalorder %s198_s13, 0  ;;  %p212_p2 = scmp.eq.s32.totalorder %s1087_s9, 1 }
   0x7   : > { %p217_p3 = scmp.ne.s32.totalorder %s1008_s28, %s1004_s27  ;;  %p218_p4 = scmp.eq.s32.totalorder %s823_s10, 1 }
   0x8   : > { %s1102_s14 = scalar_select %p199_p1, %s1012_s29, %s201_s12  }
   0x9   : > { %p1104_p5 = por %p212_p2, %p211_p0  ;;  %p1108_p6 = por %p218_p4, %p217_p3 }
   0xa   : > { %p826_p7 = scmp.ge.s32.totalorder %s1016_s30, 1  ;;  %p264_p8 = scmp.lt.s32.totalorder %s1016_s30, 3 }
   0xc   : > { %p265_p9 = pnand %p826_p7, %p264_p8 }
   0xd   : > { %p297_p10 = scmp.lt.s32.totalorder (!%p265_p9), %s1087_s9, 1  ;;  %vm315_vm0 = vcmask (!%p265_p9), 130048   ;;  %v829_v11 = vld [vmem:[%s1259_s1] ss:$0 sm:$0xff] (!%p265_p9)  ;;  %v830_v13 = vld [vmem:[%s1259_s1 + $0x1] ss:$0 sm:$0xff] (!%p265_p9) }
   0xe   : > { %268 = sbr.rel (%p265_p9) target bundleno = 2460 (0x99c), region = 52  ;;  %v373_v16 = vld [vmem:[%s1262_s4] sm:$0xf] (!%p265_p9)  ;;  %vm382_vm1 = vcmask (!%p265_p9), 1043456   ;;  %v1018_v17 = vmov (!%p265_p9), 0.0   ;;  %vm1019_vm2 = vmmov (!%p265_p9), 0  }
   0xf   : > { %864 = vmatprep.subr.bf16.mxu0 (!%p265_p9), %v1018_v17  ;;  %v384_v18 = vsel (!%p265_p9), %vm382_vm1, %v373_v16, 0  ;;  %870 = vmatprep.subr.bf16.mxu1 (!%p265_p9), %v1018_v17  ;;  %vm378_vm3 = vcmask (!%p265_p9), 64512   ;;  %v831_v22 = vld [vmem:[%s1260_s2] ss:$0 sm:$0xff] (!%p265_p9)  ;;  %vm437_vm4 = vcmask (!%p265_p9), 261120   ;;  %v934_v52 = vld [vmem:[%s1263_s5 + $0x8] sm:$0xff] (!%p265_p9)  }
  0x10   : > { %865 = vmatpush3.bf16.msra.mxu0 (!%p265_p9), %v384_v18  ;;  %866 = vmatprep.mubr.msk.bf16.mxu0 (!%p265_p9), %vm1019_vm2, %v1018_v17  ;;  %v933_v51 = vld [vmem:[%s1263_s5] sm:$0xff] (!%p265_p9)   ;;  %s1020_s12 = smov (!%p265_p9), [#allocation2]  }
  0x11   : > { %878 = vmatprep.subr.bf16.mxu0 (!%p265_p9), %v1018_v17  ;;  %874 = vmatprep.mubr.msk.bf16.mxu1 (!%p265_p9), %vm1019_vm2, %v1018_v17  ;;  %v833_v61 = vld [vmem:[%s1260_s2 + $0x1] ss:$0 sm:$0xff] (!%p265_p9)  ;;  %s958_s13 = sshll.u32 (!%p265_p9), %s1020_s12, 4  ;;  %s959_s13 = int_to_ptr.vmem [resolvable:$false] %s958_s13 }
  0x12   : > { %871 = vmatpush3.bf16.msra.mxu1 (!%p265_p9), %v933_v51  ;;  %v937_v51 = vld [vmem:[%s1265_s7 + $0x8] sm:$0xff] (!%p265_p9)  }
  0x13   : > { %872 = vmatprep.subr.bf16.mxu1 (!%p265_p9), %v1018_v17 }
  0x15   : > { %s298_s17 = scalar_select %p297_p10, %s1087_s9, 1 }
  0x16   : > { %873 = vmatpush3.bf16.msra.mxu1 %v934_v52 }
  0x17   : > { %s828_s18 = sshll.u32 %s298_s17, 3  ;;  %884 = vmatprep.subr.bf16.mxu1 %v1018_v17  ;;  %s294_s17 = sand.u32 1, %s1008_s28  }
  0x18   : > { %s300_s21 = scalar_lea.vmem %s1258_s0, %s828_s18  ;;  %s827_s18 = sshll.u32 %s294_s17, 3 }
  0x19   : > { %v1119_v0 = vld [vmem:[%s300_s21] sm:$0xff]  ;;  %s851_s21 = sshll.u32 %s1087_s9, 7  ;;  %s296_s22 = scalar_lea.vmem [#allocation2], %s827_s18 }
  0x1a   : > { %v316_v1 = vsel %vm315_vm0, %v1119_v0, 0.0  ;;  %s764_s23 = sshll.u32 %s296_s22, 4  ;;  %s1215_s26 = scalar_lea.hbm %s1266_s8, %s851_s21  ;;  %s1217_s23 = int_to_ptr.vmem [resolvable:$true] %s764_s23 }
  0x1b   : > { %317 = vadd.xlane.f32.xlu0 %v316_v1  ;;  %s751_s9 = scalar_lea.sflag [#allocation3], %s294_s17  ;;  %s954_s10 = scalar_lea.vmem %s1217_s23, 128 }
  0x1c   : > { %p955_p11 = scmp.ne.s32.totalorder %s1217_s23, %s954_s10  ;;  %s960_s18 = scalar_lea.vmem %s959_s13, 256 }
  0x1d   : > { %p961_p0 = scmp.lt.s32.totalorder %s1217_s23, %s959_s13  ;;  %p962_p1 = scmp.lt.s32.totalorder %s960_s18, %s954_s10 }
  0x1e   : > { %p956_p12 = pnand %p955_p11, %p1104_p5 }
  0x1f   : > { %p963_p2 = por %p962_p1, %p961_p0 }
  0x20   : > { %p957_p13 = pneg %p956_p12 }
  0x22   : > { %p964_p3 = pnand %p963_p2, %p957_p13 }
  0xa8   : > { %v318_v2 = vpop.xlane.xlu0 %317 }
  0xa9   : > { %v320_v3 = vmul.f32 0.0625, %v318_v2  ;;  %v834_v2 = vld [vmem:[%s1260_s2 + $0x2] ss:$0 sm:$0xff] }
  0xab   : > { %v321_v4 = vsub.f32 %v1119_v0, %v320_v3 }
  0xad   : > { %v322_v5 = vmul.f32 %v321_v4, %v321_v4 }
  0xaf   : > { %v323_v6 = vsel %vm315_vm0, %v322_v5, 0.0 }
  0xb0   : > { %324 = vadd.xlane.f32.xlu0 %v323_v6 }
 0x13d   : > { %v325_v7 = vpop.xlane.xlu0 %324 }
 0x13e   : > { %v326_v8 = vmul.f32 0.0625, %v325_v7  ;;  %v835_v7 = vld [vmem:[%s1261_s3] ss:$0 sm:$0xff] }
 0x140   : > { %v327_v9 = vadd.f32 1e-05, %v326_v8 }
 0x142   : > { %938 = vrsqrt.f32 %v327_v9 }
 0x14c   : > { %v939_v10 = vpop.eup %938 }
 0x14d   : > { %v329_v12 = vmul.f32 %v939_v10, %v321_v4 }
 0x14f   : > { %v334_v14 = vmul.f32 %v829_v11, %v329_v12 }
 0x151   : > { %v339_v15 = vadd.f32 %v830_v13, %v334_v14 }
 0x153   : > { %340 = vxpose.xlu1.b32.start.end [1/1] (short) (narrow) %v339_v15, 16 }
 0x1d3   : > { %v356_v19 = vpop.trf.xlu1 }
 0x1d7   : > { %v357_v20 = vpop.trf.xlu1 }
 0x1d8   : > { %v372_v21 = vpack.c.bf16 %v357_v20, %v356_v19 }
 0x1da   : > { %867 = vmatmul.mubr.msk.bf16.vlgmr.msra.gmra.mrb[0].mxu0 %vm378_vm3, %v372_v21 }
 0x1db   : > { %880 = vmatprep.mubr.msk.bf16.mxu0 %vm1019_vm2, %v1018_v17 }
 0x2ad   : > { %v420_v23 = vpop.f32.mrb[0].mxu0 }
 0x2ae   : > { %v421_v24 = vadd.f32 %v831_v22, %v420_v23  ;;  %v868_v25 = vpop.f32.mrb[1].mxu0  ;;  %v935_v23 = vld [vmem:[%s1264_s6] sm:$0xff]  }
 0x2af   : > { %v423_v26 = vpop.f32.mrb[2].mxu0  ;;  %879 = vmatpush3.bf16.msra.mxu0 %v935_v23 }
 0x2b0   : > { %v429_v27 = vmul.f32 0.70710677, %v421_v24  ;;  %v424_v28 = vadd.f32 %v831_v22, %v423_v26  ;;  %v869_v29 = vpop.f32.mrb[3].mxu0  ;;  %v427_v32 = vmul.f32 0.5, %v421_v24 }
 0x2b1   : > { %v840_v29 = vld [vmem:[%s1259_s1 + $0x3] ss:$0 sm:$0xff] }
 0x2b2   : > { %940 = verf.f32 %v429_v27  ;;  %v430_v30 = vmul.f32 0.70710677, %v424_v28  ;;  %v428_v35 = vmul.f32 0.5, %v424_v28  ;;  %v839_v27 = vld [vmem:[%s1259_s1 + $0x2] ss:$0 sm:$0xff] }
 0x2b4   : > { %942 = verf.f32 %v430_v30 }
 0x2bc   : > { %v941_v31 = vpop.eup %940 }
 0x2bd   : > { %v433_v33 = vadd.f32 1.0, %v941_v31 }
 0x2be   : > { %v943_v34 = vpop.eup %942 }
 0x2bf   : > { %v435_v36 = vmul.f32 %v433_v33, %v427_v32  ;;  %v434_v37 = vadd.f32 1.0, %v943_v34  ;;  %v841_v33 = vld [vmem:[%s1260_s2 + $0x3] ss:$0 sm:$0xff] }
 0x2c1   : > { %v438_v38 = vsel %vm437_vm4, %v435_v36, 0.0  ;;  %v436_v39 = vmul.f32 %v434_v37, %v428_v35 }
 0x2c2   : > { %439 = vadd.xlane.f32.xlu1 %v438_v38 }
 0x2c3   : > { %v441_v40 = vsel %vm437_vm4, %v436_v39, 0.0 }
 0x2c4   : > { %442 = vadd.xlane.f32.xlu0 %v441_v40 }
 0x34f   : > { %v440_v41 = vpop.xlane.xlu1 %439 }
 0x350   : > { %v445_v42 = vmul.f32 0.03125, %v440_v41 }
 0x351   : > { %v443_v43 = vpop.xlane.xlu0 %442 }
 0x352   : > { %v447_v44 = vsub.f32 %v435_v36, %v445_v42  ;;  %v446_v45 = vmul.f32 0.03125, %v443_v43 }
 0x354   : > { %v448_v46 = vsub.f32 %v436_v39, %v446_v45  ;;  %v449_v47 = vmul.f32 %v447_v44, %v447_v44 }
 0x356   : > { %v451_v48 = vsel %vm437_vm4, %v449_v47, 0.0  ;;  %v450_v49 = vmul.f32 %v448_v46, %v448_v46 }
 0x357   : > { %452 = vadd.xlane.f32.xlu0 %v451_v48 }
 0x358   : > { %v454_v50 = vsel %vm437_vm4, %v450_v49, 0.0 }
 0x35b   : > { %455 = vadd.xlane.f32.xlu0 %v454_v50  ;;  %v936_v50 = vld [vmem:[%s1265_s7] sm:$0xff]  }
 0x3e4   : > { %v453_v53 = vpop.xlane.xlu0 %452 }
 0x3e5   : > { %v457_v54 = vmul.f32 0.03125, %v453_v53 }
 0x3e7   : > { %v459_v55 = vadd.f32 1e-05, %v457_v54 }
 0x3e8   : > { %v456_v56 = vpop.xlane.xlu0 %455 }
 0x3e9   : > { %944 = vrsqrt.f32 %v459_v55  ;;  %v458_v57 = vmul.f32 0.03125, %v456_v56  ;;  %v844_v56 = vld [vmem:[%s1260_s2 + $0x4] ss:$0 sm:$0xff] }
 0x3eb   : > { %v460_v58 = vadd.f32 1e-05, %v458_v57 }
 0x3ed   : > { %946 = vrsqrt.f32 %v460_v58 }
 0x3f3   : > { %v945_v59 = vpop.eup %944 }
 0x3f4   : > { %v463_v60 = vmul.f32 %v945_v59, %v447_v44 }
 0x3f6   : > { %v469_v1 = vmul.f32 %v833_v61, %v463_v60 }
 0x3f7   : > { %v947_v62 = vpop.eup %946 }
 0x3f8   : > { %v464_v63 = vmul.f32 %v947_v62, %v448_v46  ;;  %v475_v4 = vadd.f32 %v834_v2, %v469_v1 }
 0x3fa   : > { %v470_v3 = vmul.f32 %v833_v61, %v464_v63  ;;  %v846_v61 = vld [vmem:[%s1259_s1 + $0x4] ss:$0 sm:$0xff] }
 0x3fc   : > { %v476_v5 = vadd.f32 %v834_v2, %v470_v3 }
 0x3fe   : > { %v477_v6 = vpack.c.bf16 %v476_v5, %v475_v4 }
 0x400   : > { %875 = vmatmul.mubr.msk.bf16.vlgmr.msra.gmra.mrb[0].mxu1 %vm437_vm4, %v477_v6 }
 0x401   : > { %888 = vmatprep.mubr.msk.bf16.mxu1 %vm1019_vm2, %v1018_v17  ;;  %885 = vmatpush3.bf16.msra.mxu1 %v936_v50 }
 0x402   : > { %886 = vmatprep.subr.bf16.mxu1 %v1018_v17  ;;  %v845_v17 = vld [vmem:[%s1260_s2 + $0x5] ss:$0 sm:$0xff] }
 0x405   : > { %887 = vmatpush3.bf16.msra.mxu1 %v937_v51 }
 0x4d3   : > { %v537_v8 = vpop.f32.mrb[0].mxu1 }
 0x4d4   : > { %v538_v9 = vadd.f32 %v835_v7, %v537_v8  ;;  %v876_v10 = vpop.f32.mrb[1].mxu1 }
 0x4d5   : > { %v540_v11 = vpop.f32.mrb[2].mxu1 }
 0x4d6   : > { %544 = vxpose.xlu0.b32.start [1/2] (short) (narrow) %v538_v9, 8  ;;  %v877_v12 = vpop.f32.mrb[3].mxu1  ;;  %v541_v13 = vadd.f32 %v835_v7, %v540_v11 }
 0x4da   : > { %545 = vxpose.xlu0.b32.end [2/2] (short) (narrow) %v541_v13, 8 }
 0x556   : > { %v560_v14 = vpop.trf.xlu0 }
 0x557   : > { %v1171_v15 = vadd.f32 %v560_v14, %v1119_v0 }
 0x559   : > { %v577_v16 = vsel %vm315_vm0, %v1171_v15, 0.0 }
 0x55a   : > { %578 = vadd.xlane.f32.xlu1 %v577_v16 }
 0x5e7   : > { %v579_v18 = vpop.xlane.xlu1 %578 }
 0x5e8   : > { %v580_v19 = vmul.f32 0.0625, %v579_v18 }
 0x5ea   : > { %v581_v20 = vsub.f32 %v1171_v15, %v580_v19 }
 0x5ec   : > { %v582_v21 = vmul.f32 %v581_v20, %v581_v20 }
 0x5ee   : > { %v583_v22 = vsel %vm315_vm0, %v582_v21, 0.0 }
 0x5ef   : > { %584 = vadd.xlane.f32.xlu1 %v583_v22 }
 0x67c   : > { %v585_v24 = vpop.xlane.xlu1 %584 }
 0x67d   : > { %v586_v0 = vmul.f32 0.0625, %v585_v24 }
 0x67f   : > { %v587_v25 = vadd.f32 1e-05, %v586_v0 }
 0x681   : > { %948 = vrsqrt.f32 %v587_v25 }
 0x68b   : > { %v949_v26 = vpop.eup %948 }
 0x68c   : > { %v589_v28 = vmul.f32 %v949_v26, %v581_v20 }
 0x68e   : > { %v594_v30 = vmul.f32 %v839_v27, %v589_v28 }
 0x690   : > { %v599_v31 = vadd.f32 %v840_v29, %v594_v30 }
 0x692   : > { %v600_v32 = vpack.c.bf16 %v599_v31, %v599_v31 }
 0x694   : > { %881 = vmatmul.mubr.msk.bf16.vlgmr.msra.gmra.mrb[4].mxu0 %vm315_vm0, %v600_v32 }
 0x767   : > { %v650_v34 = vpop.f32.mrb[4].mxu0 }
 0x768   : > { %v651_v35 = vadd.f32 %v841_v33, %v650_v34  ;;  %v882_v36 = vpop.f32.mrb[5].mxu0 }
 0x769   : > { %v653_v37 = vpop.f32.mrb[6].mxu0 }
 0x76a   : > { %v657_v38 = vmul.f32 0.70710677, %v651_v35  ;;  %v883_v39 = vpop.f32.mrb[7].mxu0  ;;  %v656_v41 = vmul.f32 0.5, %v651_v35 }
 0x76c   : > { %950 = verf.f32 %v657_v38 }
 0x776   : > { %v951_v40 = vpop.eup %950 }
 0x777   : > { %v659_v42 = vadd.f32 1.0, %v951_v40 }
 0x779   : > { %v660_v43 = vmul.f32 %v659_v42, %v656_v41 }
 0x77b   : > { %v661_v44 = vsel %vm437_vm4, %v660_v43, 0.0 }
 0x77c   : > { %662 = vadd.xlane.f32.xlu1 %v661_v44 }
 0x809   : > { %v663_v45 = vpop.xlane.xlu1 %662 }
 0x80a   : > { %v664_v46 = vmul.f32 0.03125, %v663_v45 }
 0x80c   : > { %v665_v47 = vsub.f32 %v660_v43, %v664_v46 }
 0x80e   : > { %v666_v48 = vmul.f32 %v665_v47, %v665_v47 }
 0x810   : > { %v667_v49 = vsel %vm437_vm4, %v666_v48, 0.0 }
 0x811   : > { %668 = vadd.xlane.f32.xlu1 %v667_v49 }
 0x89e   : > { %v669_v52 = vpop.xlane.xlu1 %668 }
 0x89f   : > { %v670_v53 = vmul.f32 0.03125, %v669_v52 }
 0x8a1   : > { %v671_v54 = vadd.f32 1e-05, %v670_v53 }
 0x8a3   : > { %952 = vrsqrt.f32 %v671_v54 }
 0x8ad   : > { %v953_v55 = vpop.eup %952 }
 0x8ae   : > { %v673_v57 = vmul.f32 %v953_v55, %v665_v47 }
 0x8b0   : > { %v678_v58 = vmul.f32 %v844_v56, %v673_v57 }
 0x8b2   : > { %v683_v59 = vadd.f32 %v845_v17, %v678_v58 }
 0x8b4   : > { %v684_v60 = vpack.c.bf16 %v683_v59, %v683_v59 }
 0x8b6   : > { %889 = vmatmul.mubr.msk.bf16.vlgmr.msra.gmra.mrb[4].mxu1 %vm437_vm4, %v684_v60 }
 0x989   : > { %v742_v62 = vpop.f32.mrb[4].mxu1 }
 0x98a   : > { %v743_v63 = vadd.f32 %v846_v61, %v742_v62  ;;  %v890_v1 = vpop.f32.mrb[5].mxu1 }
 0x98b   : > { %v745_v2 = vpop.f32.mrb[6].mxu1 }
 0x98c   : > { %v748_v3 = vadd.f32 %v743_v63, %v1171_v15  ;;  %v891_v4 = vpop.f32.mrb[7].mxu1 }
 0x98e   : > { %749 = vst.msk [vmem:[%s296_s22] sm:$0xff] %vm315_vm0, %v748_v3 }
 0x98f   : > { %967 = shalt.err (!%p964_p3)
}
 0x990   : > { %s968_s17 = scalar_lea.hbm %s1215_s26, 128  ;;  %s972_s21 = scalar_lea.hbm %s1266_s8, 256 }
 0x991   : > { %p969_p4 = scmp.ne.s32.totalorder %s1215_s26, %s968_s17  ;;  %p973_p9 = scmp.lt.u32.totalorder %s1215_s26, %s1266_s8 }
 0x992   : > { %p974_p10 = scmp.lt.u32.totalorder %s972_s21, %s968_s17  ;;  %p976_p12 = scmp.lt.u32.totalorder %s968_s17, %s1215_s26 }
 0x993   : > { %p970_p7 = pnand %p969_p4, %p1104_p5 }
 0x994   : > { %p975_p11 = por %p974_p10, %p973_p9 }
 0x995   : > { %p971_p8 = pneg %p970_p7 }
 0x996   : > { %p977_p13 = por %p976_p12, %p975_p11 }
 0x998   : > { %p978_p0 = pnand %p977_p13, %p971_p8 }
 0x99a   : > { %981 = shalt.err (!%p978_p0)
}
 0x99b   : > { %892 = dma.vmem_to_hbm [thread:$0]  (%p1104_p5), %s1217_s23, 128, %s1215_s26, %s751_s9  }
 0x99c PF: > { %p898_p1 = scmp.ge.s32.totalorder %s1016_s30, 2  ;;  %s776_s25 = sand.u32 1, %s1004_s27  }
 0x99d   : > { %s777_s10 = scalar_lea.sflag [#allocation3], %s776_s25 }
 0x99e   : > { %p895_p2 = pnand %p898_p1, %p1108_p6 }
 0x9a0   : > { %999 = dma.done.wait (!%p895_p2), %s777_s10, 128  }
 0x9a1   : > { %1001 = vsyncadd (!%p895_p2), %s777_s10, 4294967168  ;;  %p18_p3 = scmp.ge.s32.totalorder %s1091_s11, 4   ;;  %s1269_s27 = smov %s1008_s28 }
 0x9a2   : > { %s1270_s28 = smov %s1012_s29  ;;  %s1271_s29 = smov %s1102_s14 }
 0x9a3   : > { %s1272_s30 = smov %s1091_s11  ;;  %20 = sbr.rel (!%p18_p3) target bundleno = 3 (0x3), region = 87 }
 0x9aa   :  { %782 = vsyncpa [#allocation3], 1 }
 0x9ab   :  { %784 = vsyncpa [#allocation3 + $0x1], 1 }

</bundles_post_ra>
